<compile_context>
chip_gen: v7x
topology: tpu7x:2x2x1
jax: 0.10.0
libtpu: 0.0.40
codegen_flags: <defaults>
</compile_context>

<pallas_src>
import functools

import jax
import jax.numpy as jnp
import numpy as np
from jax import lax
from jax.experimental import pallas as pl
from jax.experimental.pallas import tpu as pltpu


def _round_up(x, m):
    return (x + m - 1) // m * m


# ----------------------------------------------------------------------------
# Pallas kernels (one fused kernel per layer)
# ----------------------------------------------------------------------------
def _gemm_bn_relu_kernel(wt_ref, pt_ref, bias_ref, gamma_ref, beta_ref, o_ref, *,
                         m_true, eps):
    """out = ReLU(BN(W^T @ patches^T + bias)) on a (Cout_pad, M_pad) slab.

    wt_ref : (Cp, Kp) bf16  rows = cout, cols = (ci, ky, kx) taps of the flipped kernel
    pt_ref : (Kp, Mp) bf16  im2col patches, transposed; M = N*H_out*W_out on lanes
    bias/gamma/beta : (Cp, 1) f32
    o_ref  : (Cp, Mp) bf16
    BatchNorm uses training-mode batch statistics (biased variance) over the m_true valid
    lanes -- identical to PyTorch's forward. Single block => no cross-tile stats hazard.
    """
    acc = jnp.dot(wt_ref[...], pt_ref[...], preferred_element_type=jnp.float32)
    acc = acc + bias_ref[...]                                     # (Cp, Mp) f32
    cols = lax.broadcasted_iota(jnp.int32, acc.shape, 1)
    valid = cols < m_true
    cnt = jnp.float32(m_true)
    mean = jnp.sum(jnp.where(valid, acc, 0.0), axis=1, keepdims=True) / cnt
    d = jnp.where(valid, acc - mean, 0.0)
    var = jnp.sum(d * d, axis=1, keepdims=True) / cnt             # biased var (train fwd)
    inv = lax.rsqrt(var + eps)
    y = (acc - mean) * inv * gamma_ref[...] + beta_ref[...]
    o_ref[...] = jnp.maximum(y, 0.0).astype(o_ref.dtype)


def _gemm_tanh_kernel(wt_ref, pt_ref, bias_ref, o_ref):
    acc = jnp.dot(wt_ref[...], pt_ref[...], preferred_element_type=jnp.float32)
    o_ref[...] = jnp.tanh(acc + bias_ref[...]).astype(o_ref.dtype)


# ----------------------------------------------------------------------------
# JAX glue: im2col for ConvTranspose2d in channel-major (C, N, H, W) layout
# ----------------------------------------------------------------------------
def _build_patches_t(a, k, stride, padding):
    """a: (Cin, N, H, W) -> patches^T (Cin*k*k, N*Ho*Wo) (same dtype), plus (Ho, Wo)."""
    C, N, H, W = a.shape
    Ho = (H - 1) * stride - 2 * padding + k
    Wo = (W - 1) * stride - 2 * padding + k
    if stride == 1:
        u = a
    else:
        Hu = (H - 1) * stride + 1
        Wu = (W - 1) * stride + 1
        u = jnp.zeros((C, N, Hu, Wu), a.dtype).at[:, :, ::stride, ::stride].set(a)
    q = k - 1 - padding
    up = jnp.pad(u, ((0, 0), (0, 0), (q, q), (q, q)))
    taps = [up[:, :, ky:ky + Ho, kx:kx + Wo] for ky in range(k) for kx in range(k)]
    pt = jnp.stack(taps, axis=1).reshape(C * k * k, N * Ho * Wo)
    return pt, Ho, Wo


def _build_wt(w):
    """w: (Cin, Cout, k, k) (PyTorch ConvTranspose2d layout) ->
       (Cout, Cin*k*k) GEMM lhs with the spatially-flipped kernel, cols ordered (ci, ky, kx)."""
    Cin, Cout, k, _ = w.shape
    return w[:, :, ::-1, ::-1].transpose(1, 0, 2, 3).reshape(Cout, Cin * k * k)


def _pad2(a, rp, cp):
    r, c = a.shape
    return jnp.zeros((rp, cp), a.dtype).at[:r, :c].set(a)


def _pad_col(v, rp):
    return jnp.zeros((rp, 1), jnp.float32).at[:v.shape[0], 0].set(v.astype(jnp.float32))


# ----------------------------------------------------------------------------
# Fused layers
# ----------------------------------------------------------------------------
def fused_convT_bn_relu(a, w, b, gamma, beta, *, stride, padding):
    """ConvTranspose2d + BatchNorm2d(batch stats) + ReLU as one pallas_call.
    a: (Cin, N, H, W) bf16 -> (Cout, N, Ho, Wo) bf16."""
    Cin, N, H, W = a.shape
    _, Cout, k, _ = w.shape
    pt, Ho, Wo = _build_patches_t(a, k, stride, padding)
    M, K = N * Ho * Wo, Cin * k * k
    Kp, Mp, Cp = _round_up(K, 128), _round_up(M, 128), _round_up(Cout, 16)

    wt_p = _pad2(_build_wt(w).astype(jnp.bfloat16), Cp, Kp)
    pt_p = _pad2(pt, Kp, Mp)

    out = pl.pallas_call(
        functools.partial(_gemm_bn_relu_kernel, m_true=M, eps=1e-5),
        out_shape=jax.ShapeDtypeStruct((Cp, Mp), jnp.bfloat16),
        grid=(1,),
        in_specs=[
            pl.BlockSpec((Cp, Kp), lambda i: (0, 0)),
            pl.BlockSpec((Kp, Mp), lambda i: (0, 0)),
            pl.BlockSpec((Cp, 1), lambda i: (0, 0)),
            pl.BlockSpec((Cp, 1), lambda i: (0, 0)),
            pl.BlockSpec((Cp, 1), lambda i: (0, 0)),
        ],
        out_specs=pl.BlockSpec((Cp, Mp), lambda i: (0, 0)),
        compiler_params=pltpu.CompilerParams(dimension_semantics=("arbitrary",)),
    )(wt_p, pt_p, _pad_col(b, Cp), _pad_col(gamma, Cp), _pad_col(beta, Cp))
    return out[:Cout, :M].reshape(Cout, N, Ho, Wo)


def fused_convT_tanh(a, w, b, *, stride, padding, m_tiles=2):
    """Final ConvTranspose2d + Tanh. No batch stats, so M is tiled over a parallel grid
    (keeps both TensorCores busy on v7x). a: (Cin, N, H, W) bf16 -> (Cout, N, Ho, Wo) f32."""
    Cin, N, H, W = a.shape
    _, Cout, k, _ = w.shape
    pt, Ho, Wo = _build_patches_t(a, k, stride, padding)
    M, K = N * Ho * Wo, Cin * k * k
    Kp, Cp = _round_up(K, 128), _round_up(Cout, 16)
    Mp = _round_up(M, 128 * m_tiles)
    TM = Mp // m_tiles

    wt_p = _pad2(_build_wt(w).astype(jnp.bfloat16), Cp, Kp)
    pt_p = _pad2(pt, Kp, Mp)

    out = pl.pallas_call(
        _gemm_tanh_kernel,
        out_shape=jax.ShapeDtypeStruct((Cp, Mp), jnp.float32),
        grid=(m_tiles,),
        in_specs=[
            pl.BlockSpec((Cp, Kp), lambda i: (0, 0)),
            pl.BlockSpec((Kp, TM), lambda i: (0, i)),
            pl.BlockSpec((Cp, 1), lambda i: (0, 0)),
        ],
        out_specs=pl.BlockSpec((Cp, TM), lambda i: (0, i)),
        compiler_params=pltpu.CompilerParams(dimension_semantics=("parallel",)),
    )(wt_p, pt_p, _pad_col(b, Cp))
    return out[:Cout, :M].reshape(Cout, N, Ho, Wo)


def generator_forward(x, p):
    """x: (N, z_dim, 1, 1) NCHW f32 -> (N, channels_img, 28, 28) NCHW f32."""
    a = jnp.transpose(x, (1, 0, 2, 3)).astype(jnp.bfloat16)      # channel-major internal layout
    a = fused_convT_bn_relu(a, p["w1"], p["b1"], p["g1"], p["be1"], stride=1, padding=0)
    a = fused_convT_bn_relu(a, p["w2"], p["b2"], p["g2"], p["be2"], stride=2, padding=1)
    y = fused_convT_tanh(a, p["w3"], p["b3"], stride=2, padding=1)
    return jnp.transpose(y, (1, 0, 2, 3))                         # back to NCHW (once)


# ----------------------------------------------------------------------------
# Pure-JAX f32 reference (lax.conv_general_dilated) for verification
# ----------------------------------------------------------------------------
def _conv_transpose_ref(x, w, b, stride, padding):
    k = w.shape[2]
    rhs = jnp.transpose(w[:, :, ::-1, ::-1], (1, 0, 2, 3))        # (Cout, Cin, k, k)
    pad = k - 1 - padding
    y = lax.conv_general_dilated(
        x, rhs, window_strides=(1, 1), padding=[(pad, pad), (pad, pad)],
        lhs_dilation=(stride, stride),
        dimension_numbers=("NCHW", "OIHW", "NCHW"),
        precision=lax.Precision.HIGHEST)
    return y + b.reshape(1, -1, 1, 1)


def generator_ref(x, p, eps=1e-5):
    def bn_relu(y, g, b):
        mean = jnp.mean(y, axis=(0, 2, 3), keepdims=True)
        var = jnp.mean(jnp.square(y - mean), axis=(0, 2, 3), keepdims=True)
        yn = (y - mean) * lax.rsqrt(var + eps) * g.reshape(1, -1, 1, 1) + b.reshape(1, -1, 1, 1)
        return jnp.maximum(yn, 0.0)

    y = bn_relu(_conv_transpose_ref(x, p["w1"], p["b1"], 1, 0), p["g1"], p["be1"])
    y = bn_relu(_conv_transpose_ref(y, p["w2"], p["b2"], 2, 1), p["g2"], p["be2"])
    return jnp.tanh(_conv_transpose_ref(y, p["w3"], p["b3"], 2, 1))


# ----------------------------------------------------------------------------
def make_params(key, z_dim, channels_img, features_g):
    ks = jax.random.split(key, 12)

    def u(k, shape, fan):
        bound = 1.0 / float(np.sqrt(fan))
        return jax.random.uniform(k, shape, jnp.float32, -bound, bound)

    fg2 = features_g * 2
    p = {
        "w1": u(ks[0], (z_dim, fg2, 7, 7), z_dim * 49),
        "b1": u(ks[1], (fg2,), z_dim * 49),
        "g1": 1.0 + 0.1 * jax.random.normal(ks[2], (fg2,), jnp.float32),
        "be1": 0.1 * jax.random.normal(ks[3], (fg2,), jnp.float32),
        "w2": u(ks[4], (fg2, features_g, 4, 4), fg2 * 16),
        "b2": u(ks[5], (features_g,), fg2 * 16),
        "g2": 1.0 + 0.1 * jax.random.normal(ks[6], (features_g,), jnp.float32),
        "be2": 0.1 * jax.random.normal(ks[7], (features_g,), jnp.float32),
        "w3": u(ks[8], (features_g, channels_img, 4, 4), features_g * 16),
        "b3": u(ks[9], (channels_img,), features_g * 16),
    }
    return p


if __name__ == "__main__":
    N, z_dim, channels_img, features_g = 2, 32, 3, 8
    key = jax.random.PRNGKey(0)
    kx, kp = jax.random.split(key)
    x = jax.random.normal(kx, (N, z_dim, 1, 1), jnp.float32)
    params = make_params(kp, z_dim, channels_img, features_g)

    fwd = jax.jit(generator_forward)
    out = jax.block_until_ready(fwd(x, params))
    assert out.shape == (N, channels_img, 28, 28), out.shape

    ref = jax.block_until_ready(generator_ref(x, params))
    err = float(jnp.max(jnp.abs(out - ref)))
    # bf16 MXU operands (f32 accumulate) vs f32 reference: typical max-abs err ~5e-3.
    assert err < 4e-2, f"max abs err {err}"

    print("KERNEL_OK")
</pallas_src>

<mosaic_0001>
module attributes {stable_mosaic.version = 11 : i64} {
  func.func @_gemm_bn_relu_kernel(%arg0: i32, %arg1: memref<16x1664xbf16, #tpu.memory_space<vmem>>, %arg2: memref<1664x128xbf16, #tpu.memory_space<vmem>>, %arg3: memref<16x1xf32, #tpu.memory_space<vmem>>, %arg4: memref<16x1xf32, #tpu.memory_space<vmem>>, %arg5: memref<16x1xf32, #tpu.memory_space<vmem>>, %arg6: memref<16x128xbf16, #tpu.memory_space<vmem>>) attributes {dimension_semantics = [#tpu.dimension_semantics<arbitrary>], iteration_bounds = array<i64: 1>, scalar_prefetch = 0 : i64, scratch_operands = 0 : i64, tpu.core_type = #tpu.core_type<tc>, window_params = [{pipeline_mode = #tpu.pipeline_mode<synchronous>, transform_indices = @transform_0, window_bounds = array<i64: 16, 1664>}, {pipeline_mode = #tpu.pipeline_mode<synchronous>, transform_indices = @transform_1, window_bounds = array<i64: 1664, 128>}, {pipeline_mode = #tpu.pipeline_mode<synchronous>, transform_indices = @transform_2, window_bounds = array<i64: 16, 1>}, {pipeline_mode = #tpu.pipeline_mode<synchronous>, transform_indices = @transform_3, window_bounds = array<i64: 16, 1>}, {pipeline_mode = #tpu.pipeline_mode<synchronous>, transform_indices = @transform_4, window_bounds = array<i64: 16, 1>}, {pipeline_mode = #tpu.pipeline_mode<synchronous>, transform_indices = @transform_5, window_bounds = array<i64: 16, 128>}]} {
    %c0 = arith.constant 0 : index
    %c0_0 = arith.constant 0 : index
    %0 = vector.load %arg1[%c0, %c0_0] : memref<16x1664xbf16, #tpu.memory_space<vmem>>, vector<16x1664xbf16>
    %c0_1 = arith.constant 0 : index
    %c0_2 = arith.constant 0 : index
    %1 = vector.load %arg2[%c0_1, %c0_2] : memref<1664x128xbf16, #tpu.memory_space<vmem>>, vector<1664x128xbf16>
    %cst = arith.constant dense<0.000000e+00> : vector<16x128xf32>
    %2 = tpu.matmul %0, %1, %cst {dimension_numbers = #tpu.dot_dimension_numbers<[1], [0], [0], [1], [0, 0, 1, 1], [], []>} : vector<16x1664xbf16>, vector<1664x128xbf16>, vector<16x128xf32> -> vector<16x128xf32>
    %c0_3 = arith.constant 0 : index
    %c0_4 = arith.constant 0 : index
    %3 = vector.load %arg3[%c0_3, %c0_4] : memref<16x1xf32, #tpu.memory_space<vmem>>, vector<16x1xf32>
    %4 = vector.broadcast %3 : vector<16x1xf32> to vector<16x128xf32>
    %5 = arith.addf %2, %4 : vector<16x128xf32>
    %6 = tpu.iota {dimensions = array<i32: 1>} : vector<16x128xi32>
    %c98_i32 = arith.constant 98 : i32
    %7 = vector.broadcast %c98_i32 : i32 to vector<16x128xi32>
    %8 = arith.cmpi slt, %6, %7 : vector<16x128xi32>
    %cst_5 = arith.constant 0.000000e+00 : f32
    %9 = vector.broadcast %cst_5 : f32 to vector<16x128xf32>
    %10 = arith.select %8, %5, %9 : vector<16x128xi1>, vector<16x128xf32>
    %cst_6 = arith.constant dense<0.000000e+00> : vector<16xf32>
    %11 = vector.multi_reduction <add>, %10, %cst_6 [1] : vector<16x128xf32> to vector<16xf32>
    %12 = vector.shape_cast %11 : vector<16xf32> to vector<16x1xf32>
    %cst_7 = arith.constant 9.800000e+01 : f32
    %13 = vector.broadcast %cst_7 : f32 to vector<16x1xf32>
    %14 = arith.divf %12, %13 : vector<16x1xf32>
    %15 = vector.broadcast %14 : vector<16x1xf32> to vector<16x128xf32>
    %16 = arith.subf %5, %15 : vector<16x128xf32>
    %cst_8 = arith.constant 0.000000e+00 : f32
    %17 = vector.broadcast %cst_8 : f32 to vector<16x128xf32>
    %18 = arith.select %8, %16, %17 : vector<16x128xi1>, vector<16x128xf32>
    %19 = arith.mulf %18, %18 : vector<16x128xf32>
    %cst_9 = arith.constant dense<0.000000e+00> : vector<16xf32>
    %20 = vector.multi_reduction <add>, %19, %cst_9 [1] : vector<16x128xf32> to vector<16xf32>
    %21 = vector.shape_cast %20 : vector<16xf32> to vector<16x1xf32>
    %cst_10 = arith.constant 9.800000e+01 : f32
    %22 = vector.broadcast %cst_10 : f32 to vector<16x1xf32>
    %23 = arith.divf %21, %22 : vector<16x1xf32>
    %cst_11 = arith.constant 9.99999974E-6 : f32
    %24 = vector.broadcast %cst_11 : f32 to vector<16x1xf32>
    %25 = arith.addf %23, %24 : vector<16x1xf32>
    %26 = math.rsqrt %25 : vector<16x1xf32>
    %27 = vector.broadcast %14 : vector<16x1xf32> to vector<16x128xf32>
    %28 = arith.subf %5, %27 : vector<16x128xf32>
    %29 = vector.broadcast %26 : vector<16x1xf32> to vector<16x128xf32>
    %30 = arith.mulf %28, %29 : vector<16x128xf32>
    %c0_12 = arith.constant 0 : index
    %c0_13 = arith.constant 0 : index
    %31 = vector.load %arg4[%c0_12, %c0_13] : memref<16x1xf32, #tpu.memory_space<vmem>>, vector<16x1xf32>
    %32 = vector.broadcast %31 : vector<16x1xf32> to vector<16x128xf32>
    %33 = arith.mulf %30, %32 : vector<16x128xf32>
    %c0_14 = arith.constant 0 : index
    %c0_15 = arith.constant 0 : index
    %34 = vector.load %arg5[%c0_14, %c0_15] : memref<16x1xf32, #tpu.memory_space<vmem>>, vector<16x1xf32>
    %35 = vector.broadcast %34 : vector<16x1xf32> to vector<16x128xf32>
    %36 = arith.addf %33, %35 : vector<16x128xf32>
    %cst_16 = arith.constant 0.000000e+00 : f32
    %37 = vector.broadcast %cst_16 : f32 to vector<16x128xf32>
    %38 = arith.maximumf %36, %37 : vector<16x128xf32>
    %39 = arith.truncf %38 : vector<16x128xf32> to vector<16x128xbf16>
    %c0_17 = arith.constant 0 : index
    %c0_18 = arith.constant 0 : index
    %40 = vector.load %arg6[%c0_17, %c0_18] : memref<16x128xbf16, #tpu.memory_space<vmem>>, vector<16x128xbf16>
    tpu.vector_store %arg6[%c0_17, %c0_18], %39 {strides = array<i32>} : memref<16x128xbf16, #tpu.memory_space<vmem>>, vector<16x128xbf16>,
    return
  }
  func.func @transform_0(%arg0: i32) -> (i32, i32) {
    %c0_i32 = arith.constant 0 : i32
    %c0_i32_0 = arith.constant 0 : i32
    %c0_i32_1 = arith.constant 0 : i32
    return %c0_i32, %c0_i32_0 : i32, i32
  }
  func.func @transform_1(%arg0: i32) -> (i32, i32) {
    %c0_i32 = arith.constant 0 : i32
    %c0_i32_0 = arith.constant 0 : i32
    %c0_i32_1 = arith.constant 0 : i32
    return %c0_i32, %c0_i32_0 : i32, i32
  }
  func.func @transform_2(%arg0: i32) -> (i32, i32) {
    %c0_i32 = arith.constant 0 : i32
    %c0_i32_0 = arith.constant 0 : i32
    %c0_i32_1 = arith.constant 0 : i32
    return %c0_i32, %c0_i32_0 : i32, i32
  }
  func.func @transform_3(%arg0: i32) -> (i32, i32) {
    %c0_i32 = arith.constant 0 : i32
    %c0_i32_0 = arith.constant 0 : i32
    %c0_i32_1 = arith.constant 0 : i32
    return %c0_i32, %c0_i32_0 : i32, i32
  }
  func.func @transform_4(%arg0: i32) -> (i32, i32) {
    %c0_i32 = arith.constant 0 : i32
    %c0_i32_0 = arith.constant 0 : i32
    %c0_i32_1 = arith.constant 0 : i32
    return %c0_i32, %c0_i32_0 : i32, i32
  }
  func.func @transform_5(%arg0: i32) -> (i32, i32) {
    %c0_i32 = arith.constant 0 : i32
    %c0_i32_0 = arith.constant 0 : i32
    %c0_i32_1 = arith.constant 0 : i32
    return %c0_i32, %c0_i32_0 : i32, i32
  }
}

module attributes {stable_mosaic.version = 11 : i64} {
  func.func @_gemm_bn_relu_kernel(%arg0: i32, %arg1: memref<16x256xbf16, #tpu.memory_space<vmem>>, %arg2: memref<256x512xbf16, #tpu.memory_space<vmem>>, %arg3: memref<16x1xf32, #tpu.memory_space<vmem>>, %arg4: memref<16x1xf32, #tpu.memory_space<vmem>>, %arg5: memref<16x1xf32, #tpu.memory_space<vmem>>, %arg6: memref<16x512xbf16, #tpu.memory_space<vmem>>) attributes {dimension_semantics = [#tpu.dimension_semantics<arbitrary>], iteration_bounds = array<i64: 1>, scalar_prefetch = 0 : i64, scratch_operands = 0 : i64, tpu.core_type = #tpu.core_type<tc>, window_params = [{pipeline_mode = #tpu.pipeline_mode<synchronous>, transform_indices = @transform_0, window_bounds = array<i64: 16, 256>}, {pipeline_mode = #tpu.pipeline_mode<synchronous>, transform_indices = @transform_1, window_bounds = array<i64: 256, 512>}, {pipeline_mode = #tpu.pipeline_mode<synchronous>, transform_indices = @transform_2, window_bounds = array<i64: 16, 1>}, {pipeline_mode = #tpu.pipeline_mode<synchronous>, transform_indices = @transform_3, window_bounds = array<i64: 16, 1>}, {pipeline_mode = #tpu.pipeline_mode<synchronous>, transform_indices = @transform_4, window_bounds = array<i64: 16, 1>}, {pipeline_mode = #tpu.pipeline_mode<synchronous>, transform_indices = @transform_5, window_bounds = array<i64: 16, 512>}]} {
    %c0 = arith.constant 0 : index
    %c0_0 = arith.constant 0 : index
    %0 = vector.load %arg1[%c0, %c0_0] : memref<16x256xbf16, #tpu.memory_space<vmem>>, vector<16x256xbf16>
    %c0_1 = arith.constant 0 : index
    %c0_2 = arith.constant 0 : index
    %1 = vector.load %arg2[%c0_1, %c0_2] : memref<256x512xbf16, #tpu.memory_space<vmem>>, vector<256x512xbf16>
    %cst = arith.constant dense<0.000000e+00> : vector<16x512xf32>
    %2 = tpu.matmul %0, %1, %cst {dimension_numbers = #tpu.dot_dimension_numbers<[1], [0], [0], [1], [0, 0, 1, 1], [], []>} : vector<16x256xbf16>, vector<256x512xbf16>, vector<16x512xf32> -> vector<16x512xf32>
    %c0_3 = arith.constant 0 : index
    %c0_4 = arith.constant 0 : index
    %3 = vector.load %arg3[%c0_3, %c0_4] : memref<16x1xf32, #tpu.memory_space<vmem>>, vector<16x1xf32>
    %4 = vector.broadcast %3 : vector<16x1xf32> to vector<16x512xf32>
    %5 = arith.addf %2, %4 : vector<16x512xf32>
    %6 = tpu.iota {dimensions = array<i32: 1>} : vector<16x512xi32>
    %c392_i32 = arith.constant 392 : i32
    %7 = vector.broadcast %c392_i32 : i32 to vector<16x512xi32>
    %8 = arith.cmpi slt, %6, %7 : vector<16x512xi32>
    %cst_5 = arith.constant 0.000000e+00 : f32
    %9 = vector.broadcast %cst_5 : f32 to vector<16x512xf32>
    %10 = arith.select %8, %5, %9 : vector<16x512xi1>, vector<16x512xf32>
    %cst_6 = arith.constant dense<0.000000e+00> : vector<16xf32>
    %11 = vector.multi_reduction <add>, %10, %cst_6 [1] : vector<16x512xf32> to vector<16xf32>
    %12 = vector.shape_cast %11 : vector<16xf32> to vector<16x1xf32>
    %cst_7 = arith.constant 3.920000e+02 : f32
    %13 = vector.broadcast %cst_7 : f32 to vector<16x1xf32>
    %14 = arith.divf %12, %13 : vector<16x1xf32>
    %15 = vector.broadcast %14 : vector<16x1xf32> to vector<16x512xf32>
    %16 = arith.subf %5, %15 : vector<16x512xf32>
    %cst_8 = arith.constant 0.000000e+00 : f32
    %17 = vector.broadcast %cst_8 : f32 to vector<16x512xf32>
    %18 = arith.select %8, %16, %17 : vector<16x512xi1>, vector<16x512xf32>
    %19 = arith.mulf %18, %18 : vector<16x512xf32>
    %cst_9 = arith.constant dense<0.000000e+00> : vector<16xf32>
    %20 = vector.multi_reduction <add>, %19, %cst_9 [1] : vector<16x512xf32> to vector<16xf32>
    %21 = vector.shape_cast %20 : vector<16xf32> to vector<16x1xf32>
    %cst_10 = arith.constant 3.920000e+02 : f32
    %22 = vector.broadcast %cst_10 : f32 to vector<16x1xf32>
    %23 = arith.divf %21, %22 : vector<16x1xf32>
    %cst_11 = arith.constant 9.99999974E-6 : f32
    %24 = vector.broadcast %cst_11 : f32 to vector<16x1xf32>
    %25 = arith.addf %23, %24 : vector<16x1xf32>
    %26 = math.rsqrt %25 : vector<16x1xf32>
    %27 = vector.broadcast %14 : vector<16x1xf32> to vector<16x512xf32>
    %28 = arith.subf %5, %27 : vector<16x512xf32>
    %29 = vector.broadcast %26 : vector<16x1xf32> to vector<16x512xf32>
    %30 = arith.mulf %28, %29 : vector<16x512xf32>
    %c0_12 = arith.constant 0 : index
    %c0_13 = arith.constant 0 : index
    %31 = vector.load %arg4[%c0_12, %c0_13] : memref<16x1xf32, #tpu.memory_space<vmem>>, vector<16x1xf32>
    %32 = vector.broadcast %31 : vector<16x1xf32> to vector<16x512xf32>
    %33 = arith.mulf %30, %32 : vector<16x512xf32>
    %c0_14 = arith.constant 0 : index
    %c0_15 = arith.constant 0 : index
    %34 = vector.load %arg5[%c0_14, %c0_15] : memref<16x1xf32, #tpu.memory_space<vmem>>, vector<16x1xf32>
    %35 = vector.broadcast %34 : vector<16x1xf32> to vector<16x512xf32>
    %36 = arith.addf %33, %35 : vector<16x512xf32>
    %cst_16 = arith.constant 0.000000e+00 : f32
    %37 = vector.broadcast %cst_16 : f32 to vector<16x512xf32>
    %38 = arith.maximumf %36, %37 : vector<16x512xf32>
    %39 = arith.truncf %38 : vector<16x512xf32> to vector<16x512xbf16>
    %c0_17 = arith.constant 0 : index
    %c0_18 = arith.constant 0 : index
    %40 = vector.load %arg6[%c0_17, %c0_18] : memref<16x512xbf16, #tpu.memory_space<vmem>>, vector<16x512xbf16>
    tpu.vector_store %arg6[%c0_17, %c0_18], %39 {strides = array<i32>} : memref<16x512xbf16, #tpu.memory_space<vmem>>, vector<16x512xbf16>,
    return
  }
  func.func @transform_0(%arg0: i32) -> (i32, i32) {
    %c0_i32 = arith.constant 0 : i32
    %c0_i32_0 = arith.constant 0 : i32
    %c0_i32_1 = arith.constant 0 : i32
    return %c0_i32, %c0_i32_0 : i32, i32
  }
  func.func @transform_1(%arg0: i32) -> (i32, i32) {
    %c0_i32 = arith.constant 0 : i32
    %c0_i32_0 = arith.constant 0 : i32
    %c0_i32_1 = arith.constant 0 : i32
    return %c0_i32, %c0_i32_0 : i32, i32
  }
  func.func @transform_2(%arg0: i32) -> (i32, i32) {
    %c0_i32 = arith.constant 0 : i32
    %c0_i32_0 = arith.constant 0 : i32
    %c0_i32_1 = arith.constant 0 : i32
    return %c0_i32, %c0_i32_0 : i32, i32
  }
  func.func @transform_3(%arg0: i32) -> (i32, i32) {
    %c0_i32 = arith.constant 0 : i32
    %c0_i32_0 = arith.constant 0 : i32
    %c0_i32_1 = arith.constant 0 : i32
    return %c0_i32, %c0_i32_0 : i32, i32
  }
  func.func @transform_4(%arg0: i32) -> (i32, i32) {
    %c0_i32 = arith.constant 0 : i32
    %c0_i32_0 = arith.constant 0 : i32
    %c0_i32_1 = arith.constant 0 : i32
    return %c0_i32, %c0_i32_0 : i32, i32
  }
  func.func @transform_5(%arg0: i32) -> (i32, i32) {
    %c0_i32 = arith.constant 0 : i32
    %c0_i32_0 = arith.constant 0 : i32
    %c0_i32_1 = arith.constant 0 : i32
    return %c0_i32, %c0_i32_0 : i32, i32
  }
}

module attributes {stable_mosaic.version = 11 : i64} {
  func.func @_gemm_tanh_kernel(%arg0: i32, %arg1: memref<16x128xbf16, #tpu.memory_space<vmem>>, %arg2: memref<128x896xbf16, #tpu.memory_space<vmem>>, %arg3: memref<16x1xf32, #tpu.memory_space<vmem>>, %arg4: memref<16x896xf32, #tpu.memory_space<vmem>>) attributes {dimension_semantics = [#tpu.dimension_semantics<parallel>], iteration_bounds = array<i64: 2>, scalar_prefetch = 0 : i64, scratch_operands = 0 : i64, tpu.core_type = #tpu.core_type<tc>, window_params = [{pipeline_mode = #tpu.pipeline_mode<synchronous>, transform_indices = @transform_0, window_bounds = array<i64: 16, 128>}, {transform_indices = @transform_1, window_bounds = array<i64: 128, 896>}, {pipeline_mode = #tpu.pipeline_mode<synchronous>, transform_indices = @transform_2, window_bounds = array<i64: 16, 1>}, {transform_indices = @transform_3, window_bounds = array<i64: 16, 896>}]} {
    %c0 = arith.constant 0 : index
    %c0_0 = arith.constant 0 : index
    %0 = vector.load %arg1[%c0, %c0_0] : memref<16x128xbf16, #tpu.memory_space<vmem>>, vector<16x128xbf16>
    %c0_1 = arith.constant 0 : index
    %c0_2 = arith.constant 0 : index
    %1 = vector.load %arg2[%c0_1, %c0_2] : memref<128x896xbf16, #tpu.memory_space<vmem>>, vector<128x896xbf16>
    %cst = arith.constant dense<0.000000e+00> : vector<16x896xf32>
    %2 = tpu.matmul %0, %1, %cst {dimension_numbers = #tpu.dot_dimension_numbers<[1], [0], [0], [1], [0, 0, 1, 1], [], []>} : vector<16x128xbf16>, vector<128x896xbf16>, vector<16x896xf32> -> vector<16x896xf32>
    %c0_3 = arith.constant 0 : index
    %c0_4 = arith.constant 0 : index
    %3 = vector.load %arg3[%c0_3, %c0_4] : memref<16x1xf32, #tpu.memory_space<vmem>>, vector<16x1xf32>
    %4 = vector.broadcast %3 : vector<16x1xf32> to vector<16x896xf32>
    %5 = arith.addf %2, %4 : vector<16x896xf32>
    %6 = math.tanh %5 : vector<16x896xf32>
    %c0_5 = arith.constant 0 : index
    %c0_6 = arith.constant 0 : index
    %7 = vector.load %arg4[%c0_5, %c0_6] : memref<16x896xf32, #tpu.memory_space<vmem>>, vector<16x896xf32>
    tpu.vector_store %arg4[%c0_5, %c0_6], %6 {strides = array<i32>} : memref<16x896xf32, #tpu.memory_space<vmem>>, vector<16x896xf32>,
    return
  }
  func.func @transform_0(%arg0: i32) -> (i32, i32) {
    %c0_i32 = arith.constant 0 : i32
    %c0_i32_0 = arith.constant 0 : i32
    %c0_i32_1 = arith.constant 0 : i32
    return %c0_i32, %c0_i32_0 : i32, i32
  }
  func.func @transform_1(%arg0: i32) -> (i32, i32) {
    %c0_i32 = arith.constant 0 : i32
    %c0_i32_0 = arith.constant 0 : i32
    return %c0_i32, %arg0 : i32, i32
  }
  func.func @transform_2(%arg0: i32) -> (i32, i32) {
    %c0_i32 = arith.constant 0 : i32
    %c0_i32_0 = arith.constant 0 : i32
    %c0_i32_1 = arith.constant 0 : i32
    return %c0_i32, %c0_i32_0 : i32, i32
  }
  func.func @transform_3(%arg0: i32) -> (i32, i32) {
    %c0_i32 = arith.constant 0 : i32
    %c0_i32_0 = arith.constant 0 : i32
    return %c0_i32, %arg0 : i32, i32
  }
}

</mosaic_0001>

<bundles_post_ra>
// kernel: generator_forward.3
= control target key start
LH: loop header
LB: loop body
LE: loop exit
PB: predicated region body
PF: predicated region fallthrough
CT: control target
= control target key end

     0   :  { %v1725_v1 = vmov 0   ;;  %vm1727_vm0 = vmmov 0   ;;  %s2134_s1 = inlined_call_operand.vmem [shape: bf16[1664,128], index: 1, kind: input, shape index: {}]   ;;  %s2135_s0 = inlined_call_operand.vmem [shape: bf16[16,1664], index: 0, kind: input, shape index: {}]   ;;  %s2136_s2 = inlined_call_operand.vmem [shape: f32[16,1], index: 2, kind: input, shape index: {}]   ;;  %s2137_s3 = inlined_call_operand.vmem [shape: f32[16,1], index: 3, kind: input, shape index: {}]   ;;  %s2138_s4 = inlined_call_operand.vmem [shape: f32[16,1], index: 4, kind: input, shape index: {}]   ;;  %s2139_s5 = inlined_call_operand.vmem [shape: bf16[16,128], index: 5, kind: output, shape index: {}]  }
   0x1   :  { %v1598_v0 = vld [vmem:[%s2134_s1 + $0x40] sm:$0xff]   ;;  %1596 = vset.pattern.permute.xlu0 %v1725_v1  ;;  %1597 = vset.pattern.permute.xlu1 %v1725_v1  ;;  %v1602_v5 = vld [vmem:[%s2134_s1 + $0x48] sm:$0xff]   ;;  %v1606_v9 = vld [vmem:[%s2134_s1 + $0x50] sm:$0xff]  }
   0x2   :  { %v1599_v2 = vld [vmem:[%s2134_s1] sm:$0xff]   ;;  %1432 = vmatprep.subr.bf16.mxu0 %v1598_v0  ;;  %v1603_v6 = vld [vmem:[%s2134_s1 + $0x8] sm:$0xff]   ;;  %v1607_v10 = vld [vmem:[%s2134_s1 + $0x10] sm:$0xff]  }
   0x3   :  { %v1600_v3 = vld [vmem:[%s2134_s1 + $0xc0] sm:$0xff]   ;;  %1433 = vmatpush3.bf16.msra.mxu0 %v1599_v2  ;;  %v1604_v7 = vld [vmem:[%s2134_s1 + $0xc8] sm:$0xff]   ;;  %v1608_v11 = vld [vmem:[%s2134_s1 + $0xd0] sm:$0xff]  }
   0x4   :  { %v1601_v4 = vld [vmem:[%s2134_s1 + $0x80] sm:$0xff]   ;;  %1454 = vmatprep.subr.bf16.mxu1 %v1600_v3  ;;  %1434 = vmatprep.subr.bf16.mxu0 %v1602_v5  ;;  %v1605_v8 = vld [vmem:[%s2134_s1 + $0x88] sm:$0xff]   ;;  %v1609_v12 = vld [vmem:[%s2134_s1 + $0x90] sm:$0xff]  }
   0x5   :  { %1455 = vmatpush3.bf16.msra.mxu1 %v1601_v4  ;;  %v1610_v13 = vld [vmem:[%s2134_s1 + $0x58] sm:$0xff]   ;;  %v1614_v17 = vld [vmem:[%s2134_s1 + $0x60] sm:$0xff]   ;;  %v1618_v21 = vld [vmem:[%s2134_s1 + $0x68] sm:$0xff]  }
   0x6   :  { %1456 = vmatprep.subr.bf16.mxu1 %v1604_v7  ;;  %v1611_v14 = vld [vmem:[%s2134_s1 + $0x18] sm:$0xff]   ;;  %v1615_v18 = vld [vmem:[%s2134_s1 + $0x20] sm:$0xff]   ;;  %v1619_v22 = vld [vmem:[%s2134_s1 + $0x28] sm:$0xff]  }
   0x7   :  { %1435 = vmatpush3.bf16.msra.mxu0 %v1603_v6  ;;  %v1612_v15 = vld [vmem:[%s2134_s1 + $0xd8] sm:$0xff]   ;;  %v1616_v19 = vld [vmem:[%s2134_s1 + $0xe0] sm:$0xff]   ;;  %v1620_v23 = vld [vmem:[%s2134_s1 + $0xe8] sm:$0xff]  }
   0x8   :  { %1436 = vmatprep.subr.bf16.mxu0 %v1606_v9  ;;  %v1613_v16 = vld [vmem:[%s2134_s1 + $0x98] sm:$0xff]   ;;  %v1617_v20 = vld [vmem:[%s2134_s1 + $0xa0] sm:$0xff]   ;;  %v1621_v24 = vld [vmem:[%s2134_s1 + $0xa8] sm:$0xff]  }
   0x9   :  { %1457 = vmatpush3.bf16.msra.mxu1 %v1605_v8  ;;  %v1622_v25 = vld [vmem:[%s2134_s1 + $0x70] sm:$0xff]   ;;  %v1626_v29 = vld [vmem:[%s2134_s1 + $0x78] sm:$0xff]   ;;  %v1633_v35 = vld [vmem:[%s2134_s1 + $0x140] sm:$0xff]  }
   0xa   :  { %1458 = vmatprep.subr.bf16.mxu1 %v1608_v11  ;;  %v1623_v26 = vld [vmem:[%s2134_s1 + $0x30] sm:$0xff]   ;;  %v1627_v30 = vld [vmem:[%s2134_s1 + $0x38] sm:$0xff]   ;;  %v1636_v37 = vld [vmem:[%s2135_s0 + $0xc] ss:$52 sps:$4 sm:$0xff]  }
   0xb   :  { %1437 = vmatpush3.bf16.msra.mxu0 %v1607_v10  ;;  %v1624_v27 = vld [vmem:[%s2134_s1 + $0xf0] sm:$0xff]   ;;  %v1628_v31 = vld [vmem:[%s2134_s1 + $0xf8] sm:$0xff]   ;;  %v1637_v38 = vld [vmem:[%s2134_s1 + $0x100] sm:$0xff]   ;;  %1018 = vmatprep.mubr.bf16.mxu1 %v1636_v37 }
   0xc   :  { %1438 = vmatprep.subr.bf16.mxu0 %v1610_v13  ;;  %v1625_v28 = vld [vmem:[%s2134_s1 + $0xb0] sm:$0xff]   ;;  %v1631_v33 = vld [vmem:[%s2135_s0 + $0x4] ss:$52 sps:$4 sm:$0xff]   ;;  %v1634_v36 = vld [vmem:[%s2135_s0 + $0x8] ss:$52 sps:$4 sm:$0xff]  }
   0xd   :  { %1459 = vmatpush3.bf16.msra.mxu1 %v1609_v12  ;;  %v1629_v32 = vld [vmem:[%s2135_s0] ss:$52 sps:$4 sm:$0xff]   ;;  %v1632_v34 = vld [vmem:[%s2134_s1 + $0xb8] sm:$0xff]   ;;  %977 = vmatprep.mubr.bf16.mxu0 %v1631_v33  ;;  %v1640_v41 = vld [vmem:[%s2134_s1 + $0x148] sm:$0xff]  }
   0xe   :  { %1460 = vmatprep.subr.bf16.mxu1 %v1612_v15  ;;  %v1638_v39 = vld [vmem:[%s2134_s1 + $0x1c0] sm:$0xff]   ;;  %v1641_v42 = vld [vmem:[%s2134_s1 + $0x108] sm:$0xff]   ;;  %v1644_v45 = vld [vmem:[%s2134_s1 + $0x150] sm:$0xff]  }
   0xf   :  { %1439 = vmatpush3.bf16.msra.mxu0 %v1611_v14  ;;  %v1639_v40 = vld [vmem:[%s2134_s1 + $0x180] sm:$0xff]   ;;  %v1642_v43 = vld [vmem:[%s2134_s1 + $0x1c8] sm:$0xff]   ;;  %v1645_v46 = vld [vmem:[%s2134_s1 + $0x110] sm:$0xff]  }
  0x10   :  { %1440 = vmatprep.subr.bf16.mxu0 %v1614_v17  ;;  %v1643_v44 = vld [vmem:[%s2134_s1 + $0x188] sm:$0xff]   ;;  %v1646_v47 = vld [vmem:[%s2134_s1 + $0x1d0] sm:$0xff]   ;;  %v1648_v49 = vld [vmem:[%s2134_s1 + $0x158] sm:$0xff]  }
  0x11   :  { %1461 = vmatpush3.bf16.msra.mxu1 %v1613_v16  ;;  %v1647_v48 = vld [vmem:[%s2134_s1 + $0x190] sm:$0xff]   ;;  %v1649_v50 = vld [vmem:[%s2134_s1 + $0x118] sm:$0xff]   ;;  %v1652_v53 = vld [vmem:[%s2134_s1 + $0x160] sm:$0xff]  }
  0x12   :  { %1462 = vmatprep.subr.bf16.mxu1 %v1616_v19  ;;  %v1650_v51 = vld [vmem:[%s2134_s1 + $0x1d8] sm:$0xff]   ;;  %v1653_v54 = vld [vmem:[%s2134_s1 + $0x120] sm:$0xff]   ;;  %v1656_v57 = vld [vmem:[%s2134_s1 + $0x168] sm:$0xff]  }
  0x13   :  { %1441 = vmatpush3.bf16.msra.mxu0 %v1615_v18  ;;  %v1651_v52 = vld [vmem:[%s2134_s1 + $0x198] sm:$0xff]   ;;  %v1654_v55 = vld [vmem:[%s2134_s1 + $0x1e0] sm:$0xff]   ;;  %v1657_v58 = vld [vmem:[%s2134_s1 + $0x128] sm:$0xff]  }
  0x14   :  { %1442 = vmatprep.subr.bf16.mxu0 %v1618_v21  ;;  %v1655_v56 = vld [vmem:[%s2134_s1 + $0x1a0] sm:$0xff]   ;;  %v1658_v59 = vld [vmem:[%s2134_s1 + $0x1e8] sm:$0xff]   ;;  %v1660_v61 = vld [vmem:[%s2134_s1 + $0x170] sm:$0xff]  }
  0x15   :  { %1463 = vmatpush3.bf16.msra.mxu1 %v1617_v20  ;;  %v1659_v60 = vld [vmem:[%s2134_s1 + $0x1a8] sm:$0xff]   ;;  %v1661_v62 = vld [vmem:[%s2134_s1 + $0x130] sm:$0xff]   ;;  %v1664_v1 = vld [vmem:[%s2134_s1 + $0x178] sm:$0xff]  }
  0x16   :  { %1464 = vmatprep.subr.bf16.mxu1 %v1620_v23  ;;  %v1662_v63 = vld [vmem:[%s2134_s1 + $0x1f0] sm:$0xff]   ;;  %v1665_v2 = vld [vmem:[%s2134_s1 + $0x138] sm:$0xff]   ;;  %v1671_v7 = vld [vmem:[%s2134_s1 + $0x240] sm:$0xff]  }
  0x17   :  { %1443 = vmatpush3.bf16.msra.mxu0 %v1619_v22  ;;  %v1663_v0 = vld [vmem:[%s2134_s1 + $0x1b0] sm:$0xff]   ;;  %v1666_v3 = vld [vmem:[%s2134_s1 + $0x1f8] sm:$0xff]   ;;  %v1675_v10 = vld [vmem:[%s2134_s1 + $0x200] sm:$0xff]  }
  0x18   :  { %1444 = vmatprep.subr.bf16.mxu0 %v1622_v25  ;;  %v1667_v4 = vld [vmem:[%s2135_s0 + $0x10] ss:$52 sps:$4 sm:$0xff]   ;;  %v1669_v5 = vld [vmem:[%s2135_s0 + $0x14] ss:$52 sps:$4 sm:$0xff]   ;;  %v1670_v6 = vld [vmem:[%s2134_s1 + $0x1b8] sm:$0xff]  }
  0x19   :  { %1465 = vmatpush3.bf16.msra.mxu1 %v1621_v24  ;;  %v1672_v8 = vld [vmem:[%s2135_s0 + $0x18] ss:$52 sps:$4 sm:$0xff]   ;;  %v1674_v9 = vld [vmem:[%s2135_s0 + $0x1c] ss:$52 sps:$4 sm:$0xff]   ;;  %v1676_v11 = vld [vmem:[%s2134_s1 + $0x2c0] sm:$0xff]  }
  0x1a   :  { %1466 = vmatprep.subr.bf16.mxu1 %v1624_v27  ;;  %v1677_v12 = vld [vmem:[%s2134_s1 + $0x280] sm:$0xff]   ;;  %v1678_v13 = vld [vmem:[%s2134_s1 + $0x248] sm:$0xff]   ;;  %v1682_v17 = vld [vmem:[%s2134_s1 + $0x250] sm:$0xff]  }
  0x1b   :  { %1445 = vmatpush3.bf16.msra.mxu0 %v1623_v26  ;;  %v1679_v14 = vld [vmem:[%s2134_s1 + $0x208] sm:$0xff]   ;;  %v1683_v18 = vld [vmem:[%s2134_s1 + $0x210] sm:$0xff]   ;;  %v1686_v21 = vld [vmem:[%s2134_s1 + $0x258] sm:$0xff]  }
  0x1c   :  { %1446 = vmatprep.subr.bf16.mxu0 %v1626_v29  ;;  %v1680_v15 = vld [vmem:[%s2134_s1 + $0x2c8] sm:$0xff]   ;;  %v1684_v19 = vld [vmem:[%s2134_s1 + $0x2d0] sm:$0xff]   ;;  %v1687_v22 = vld [vmem:[%s2134_s1 + $0x218] sm:$0xff]  }
  0x1d   :  { %1467 = vmatpush3.bf16.msra.mxu1 %v1625_v28  ;;  %v1681_v16 = vld [vmem:[%s2134_s1 + $0x288] sm:$0xff]   ;;  %v1685_v20 = vld [vmem:[%s2134_s1 + $0x290] sm:$0xff]   ;;  %v1688_v23 = vld [vmem:[%s2134_s1 + $0x2d8] sm:$0xff]  }
  0x1e   :  { %1468 = vmatprep.subr.bf16.mxu1 %v1628_v31  ;;  %v1689_v24 = vld [vmem:[%s2134_s1 + $0x298] sm:$0xff]   ;;  %v1690_v25 = vld [vmem:[%s2134_s1 + $0x260] sm:$0xff]   ;;  %v1694_v29 = vld [vmem:[%s2134_s1 + $0x268] sm:$0xff]  }
  0x1f   :  { %1447 = vmatpush3.bf16.msra.mxu0 %v1627_v30  ;;  %v1691_v26 = vld [vmem:[%s2134_s1 + $0x220] sm:$0xff]   ;;  %v1695_v30 = vld [vmem:[%s2134_s1 + $0x228] sm:$0xff]   ;;  %v1698_v33 = vld [vmem:[%s2134_s1 + $0x270] sm:$0xff]  }
  0x20   :  { %1476 = vmatprep.subr.bf16.mxu0 %v1633_v35  ;;  %v1692_v27 = vld [vmem:[%s2134_s1 + $0x2e0] sm:$0xff]   ;;  %v1696_v31 = vld [vmem:[%s2134_s1 + $0x2e8] sm:$0xff]   ;;  %v1700_v35 = vld [vmem:[%s2134_s1 + $0x2f0] sm:$0xff]  }
  0x21   :  { %1469 = vmatpush3.bf16.msra.mxu1 %v1632_v34  ;;  %v1693_v28 = vld [vmem:[%s2134_s1 + $0x2a0] sm:$0xff]   ;;  %v1699_v34 = vld [vmem:[%s2134_s1 + $0x230] sm:$0xff]   ;;  %v1702_v37 = vld [vmem:[%s2134_s1 + $0x278] sm:$0xff]  }
  0x22   :  { %978 = vmatmul.mubr.bf16.vlgmr.msra.gmra.mrb[0].mxu0 %v1629_v32  ;;  %1498 = vmatprep.subr.bf16.mxu1 %v1638_v39  ;;  %v1697_v32 = vld [vmem:[%s2134_s1 + $0x2a8] sm:$0xff]   ;;  %v1704_v39 = vld [vmem:[%s2134_s1 + $0x2f8] sm:$0xff]  }
  0x23   :  { %1477 = vmatpush3.bf16.msra.mxu0 %v1637_v38  ;;  %1059 = vmatprep.mubr.bf16.mxu0 %v1669_v5  ;;  %v1703_v38 = vld [vmem:[%s2134_s1 + $0x238] sm:$0xff]  }
  0x24   :  { %1019 = vmatmul.mubr.bf16.vlgmr.msra.gmra.mrb[0].mxu1 %v1634_v36  ;;  %1478 = vmatprep.subr.bf16.mxu0 %v1640_v41  ;;  %v1701_v36 = vld [vmem:[%s2134_s1 + $0x2b0] sm:$0xff]   ;;  %v1707_v41 = vld [vmem:[%s2135_s0 + $0x24] ss:$52 sps:$4 sm:$0xff]  }
  0x25   :  { %1499 = vmatpush3.bf16.msra.mxu1 %v1639_v40  ;;  %1100 = vmatprep.mubr.bf16.mxu1 %v1674_v9  ;;  %v1705_v40 = vld [vmem:[%s2135_s0 + $0x20] ss:$52 sps:$4 sm:$0xff]  }
  0x26   :  { %1500 = vmatprep.subr.bf16.mxu1 %v1642_v43  ;;  %v1726_v43 = vmov 0.0  }
  0x27   :  { %1479 = vmatpush3.bf16.msra.mxu0 %v1641_v42  ;;  %v1708_v42 = vld [vmem:[%s2134_s1 + $0x2b8] sm:$0xff]  }
  0x28   :  { %1480 = vmatprep.subr.bf16.mxu0 %v1644_v45  ;;  %v1711_v45 = vld [vmem:[%s2135_s0 + $0x2c] ss:$52 sps:$4 sm:$0xff]  }
  0x29   :  { %1501 = vmatpush3.bf16.msra.mxu1 %v1643_v44  ;;  %v1709_v44 = vld [vmem:[%s2135_s0 + $0x28] ss:$52 sps:$4 sm:$0xff]  }
  0x2a   :  { %1502 = vmatprep.subr.bf16.mxu1 %v1646_v47  ;;  %v1713_v47 = vld [vmem:[%s2134_s1 + $0x308] sm:$0xff]  }
  0x2b   :  { %1481 = vmatpush3.bf16.msra.mxu0 %v1645_v46  ;;  %v1712_v46 = vld [vmem:[%s2134_s1 + $0x300] sm:$0xff]  }
  0x2c   :  { %1482 = vmatprep.subr.bf16.mxu0 %v1648_v49  ;;  %v1714_v49 = vld [vmem:[%s2134_s1 + $0x310] sm:$0xff]  }
  0x2d   :  { %1503 = vmatpush3.bf16.msra.mxu1 %v1647_v48  ;;  %v243_v48 = vld [vmem:[%s2136_s2] sm:$0xff] }
  0x2e   :  { %1504 = vmatprep.subr.bf16.mxu1 %v1650_v51  ;;  %247 = vperm.xlu0 %1596, %v243_v48   ;;  %v1715_v51 = vld [vmem:[%s2134_s1 + $0x318] sm:$0xff]  }
  0x2f   :  { %1483 = vmatpush3.bf16.msra.mxu0 %v1649_v50  ;;  %v244_v50 = vld [vmem:[%s2136_s2 + $0x8] sm:$0xff] }
  0x30   :  { %1484 = vmatprep.subr.bf16.mxu0 %v1652_v53  ;;  %v1717_v53 = vld [vmem:[%s2134_s1 + $0x328] sm:$0xff]  }
  0x31   :  { %1505 = vmatpush3.bf16.msra.mxu1 %v1651_v52  ;;  %v1716_v52 = vld [vmem:[%s2134_s1 + $0x320] sm:$0xff]  }
  0x32   :  { %1506 = vmatprep.subr.bf16.mxu1 %v1654_v55  ;;  %252 = vperm.xlu0 %1596, %v244_v50   ;;  %v1719_v55 = vld [vmem:[%s2134_s1 + $0x338] sm:$0xff]  }
  0x33   :  { %1485 = vmatpush3.bf16.msra.mxu0 %v1653_v54  ;;  %v1718_v54 = vld [vmem:[%s2134_s1 + $0x330] sm:$0xff]  }
  0x34   :  { %1486 = vmatprep.subr.bf16.mxu0 %v1656_v57 }
  0x35   :  { %1507 = vmatpush3.bf16.msra.mxu1 %v1655_v56  ;;  %v1720_v56 = vld [vmem:[%s2135_s0 + $0x30] ss:$52 sps:$4 sm:$0xff]  }
  0x36   :  { %1508 = vmatprep.subr.bf16.mxu1 %v1658_v59 }
  0x37   :  { %1487 = vmatpush3.bf16.msra.mxu0 %v1657_v58 }
  0x38   :  { %1488 = vmatprep.subr.bf16.mxu0 %v1660_v61 }
  0x39   :  { %1509 = vmatpush3.bf16.msra.mxu1 %v1659_v60 }
  0x3a   :  { %1510 = vmatprep.subr.bf16.mxu1 %v1662_v63 }
  0x3b   :  { %1489 = vmatpush3.bf16.msra.mxu0 %v1661_v62 }
  0x3c   :  { %1490 = vmatprep.subr.bf16.mxu0 %v1664_v1 }
  0x3d   :  { %1511 = vmatpush3.bf16.msra.mxu1 %v1663_v0 }
  0x3e   :  { %1512 = vmatprep.subr.bf16.mxu1 %v1666_v3 }
  0x3f   :  { %1491 = vmatpush3.bf16.msra.mxu0 %v1665_v2 }
  0x40   :  { %1520 = vmatprep.subr.bf16.mxu0 %v1671_v7 }
  0x41   :  { %1513 = vmatpush3.bf16.msra.mxu1 %v1670_v6 }
  0x42   :  { %1060 = vmatmul.mubr.bf16.vlgmr.msra.gmra.mrb[4].mxu0 %v1667_v4  ;;  %1542 = vmatprep.subr.bf16.mxu1 %v1676_v11 }
  0x43   :  { %1521 = vmatpush3.bf16.msra.mxu0 %v1675_v10  ;;  %1141 = vmatprep.mubr.bf16.mxu0 %v1707_v41 }
  0x44   :  { %1101 = vmatmul.mubr.bf16.vlgmr.msra.gmra.mrb[4].mxu1 %v1672_v8  ;;  %1522 = vmatprep.subr.bf16.mxu0 %v1678_v13 }
  0x45   :  { %1543 = vmatpush3.bf16.msra.mxu1 %v1677_v12  ;;  %1182 = vmatprep.mubr.bf16.mxu1 %v1711_v45 }
  0x46   :  { %1544 = vmatprep.subr.bf16.mxu1 %v1680_v15 }
  0x47   :  { %1523 = vmatpush3.bf16.msra.mxu0 %v1679_v14 }
  0x48   :  { %1524 = vmatprep.subr.bf16.mxu0 %v1682_v17 }
  0x49   :  { %1545 = vmatpush3.bf16.msra.mxu1 %v1681_v16 }
  0x4a   :  { %1546 = vmatprep.subr.bf16.mxu1 %v1684_v19 }
  0x4b   :  { %1525 = vmatpush3.bf16.msra.mxu0 %v1683_v18 }
  0x4c   :  { %1526 = vmatprep.subr.bf16.mxu0 %v1686_v21 }
  0x4d   :  { %1547 = vmatpush3.bf16.msra.mxu1 %v1685_v20 }
  0x4e   :  { %1548 = vmatprep.subr.bf16.mxu1 %v1688_v23 }
  0x4f   :  { %1527 = vmatpush3.bf16.msra.mxu0 %v1687_v22 }
  0x50   :  { %1528 = vmatprep.subr.bf16.mxu0 %v1690_v25 }
  0x51   :  { %1549 = vmatpush3.bf16.msra.mxu1 %v1689_v24 }
  0x52   :  { %1550 = vmatprep.subr.bf16.mxu1 %v1692_v27 }
  0x53   :  { %1529 = vmatpush3.bf16.msra.mxu0 %v1691_v26 }
  0x54   :  { %1530 = vmatprep.subr.bf16.mxu0 %v1694_v29 }
  0x55   :  { %1551 = vmatpush3.bf16.msra.mxu1 %v1693_v28 }
  0x56   :  { %1552 = vmatprep.subr.bf16.mxu1 %v1696_v31 }
  0x57   :  { %1531 = vmatpush3.bf16.msra.mxu0 %v1695_v30 }
  0x58   :  { %1532 = vmatprep.subr.bf16.mxu0 %v1698_v33 }
  0x59   :  { %1553 = vmatpush3.bf16.msra.mxu1 %v1697_v32 }
  0x5a   :  { %1554 = vmatprep.subr.bf16.mxu1 %v1700_v35 }
  0x5b   :  { %1533 = vmatpush3.bf16.msra.mxu0 %v1699_v34 }
  0x5c   :  { %1534 = vmatprep.subr.bf16.mxu0 %v1702_v37 }
  0x5d   :  { %1555 = vmatpush3.bf16.msra.mxu1 %v1701_v36 }
  0x5e   :  { %1556 = vmatprep.subr.bf16.mxu1 %v1704_v39 }
  0x5f   :  { %1535 = vmatpush3.bf16.msra.mxu0 %v1703_v38 }
  0x60   :  { %1573 = vmatprep.subr.bf16.mxu0 %v1726_v43 }
  0x61   :  { %1557 = vmatpush3.bf16.msra.mxu1 %v1708_v42 }
  0x62   :  { %1142 = vmatmul.mubr.bf16.vlgmr.msra.gmra.mrb[8].mxu0 %v1705_v40 }
  0x63   :  { %1589 = vmatprep.mubr.msk.bf16.mxu0 %vm1727_vm0, %v1726_v43  ;;  %1574 = vmatpush3.bf16.msra.mxu0 %v1712_v46 }
  0x64   :  { %1183 = vmatmul.mubr.bf16.vlgmr.msra.gmra.mrb[8].mxu1 %v1709_v44  ;;  %1575 = vmatprep.subr.bf16.mxu0 %v1726_v43 }
  0x67   :  { %1576 = vmatpush3.bf16.msra.mxu0 %v1713_v47 }
  0x68   :  { %1577 = vmatprep.subr.bf16.mxu0 %v1726_v43 }
  0x6b   :  { %1578 = vmatpush3.bf16.msra.mxu0 %v1714_v49 }
  0x6c   :  { %1579 = vmatprep.subr.bf16.mxu0 %v1726_v43 }
  0x6f   :  { %1580 = vmatpush3.bf16.msra.mxu0 %v1715_v51 }
  0x70   :  { %1581 = vmatprep.subr.bf16.mxu0 %v1726_v43 }
  0x73   :  { %1582 = vmatpush3.bf16.msra.mxu0 %v1716_v52 }
  0x74   :  { %1583 = vmatprep.subr.bf16.mxu0 %v1726_v43 }
  0x77   :  { %1584 = vmatpush3.bf16.msra.mxu0 %v1717_v53  ;;  %v1262_v53 = vld [vmem:[%s2137_s3] sm:$0xff] }
  0x78   :  { %1585 = vmatprep.subr.bf16.mxu0 %v1726_v43 }
  0x7b   :  { %1586 = vmatpush3.bf16.msra.mxu0 %v1718_v54  ;;  %v1263_v54 = vld [vmem:[%s2137_s3 + $0x8] sm:$0xff] }
  0x7c   :  { %1587 = vmatprep.subr.bf16.mxu0 %v1726_v43  ;;  %v1232_v43 = vlaneseq }
  0x7e   :  { %v1233_v44 = vand.u32 127, %v1232_v43 }
  0x7f   :  { %1588 = vmatpush3.bf16.msra.mxu0 %v1719_v55  ;;  %v1276_v55 = vld [vmem:[%s2138_s4] sm:$0xff] }
  0x80   :  { %vm1234_vm1 = vcmp.lt.s32.totalorder %v1233_v44, 98 }
  0x82   :  { %1590 = vmatmul.mubr.bf16.vlgmr.msra.gmra.mrb[12].mxu0 %v1720_v56 }
  0xad   :  { %v248_v57 = vpop.permute.xlu0 %247 }
  0xb1   :  { %v253_v62 = vpop.permute.xlu0 %252 }
  0xf5   :  { %v1448_v58 = vpop.f32.mrb[0].mxu0 }
  0xf6   :  { %v1449_v59 = vpop.f32.mrb[1].mxu0 }
  0xf7   :  { %v1450_v60 = vadd.f32 %v1449_v59, %v1448_v58  ;;  %v1451_v61 = vpop.f32.mrb[2].mxu0  ;;  %v1470_v63 = vpop.f32.mrb[0].mxu1 }
  0xf8   :  { %v1452_v0 = vpop.f32.mrb[3].mxu0  ;;  %v1471_v3 = vpop.f32.mrb[1].mxu1 }
  0xf9   :  { %v980_v1 = vadd.f32 %v1450_v60, %v248_v57  ;;  %v1453_v2 = vadd.f32 %v1452_v0, %v1451_v61  ;;  %v1472_v4 = vadd.f32 %v1471_v3, %v1470_v63  ;;  %v1473_v5 = vpop.f32.mrb[2].mxu1 }
  0xfa   :  { %v1474_v7 = vpop.f32.mrb[3].mxu1 }
  0xfb   :  { %v983_v6 = vadd.f32 %v1453_v2, %v253_v62  ;;  %v1021_v8 = vadd.f32 %v1472_v4, %v980_v1  ;;  %v1475_v9 = vadd.f32 %v1474_v7, %v1473_v5  ;;  %v1277_v2 = vld [vmem:[%s2138_s4 + $0x8] sm:$0xff] }
  0xfd   :  { %v1024_v10 = vadd.f32 %v1475_v9, %v983_v6 }
 0x115   :  { %v1492_v11 = vpop.f32.mrb[4].mxu0 }
 0x116   :  { %v1493_v12 = vpop.f32.mrb[5].mxu0 }
 0x117   :  { %v1494_v13 = vadd.f32 %v1493_v12, %v1492_v11  ;;  %v1495_v14 = vpop.f32.mrb[6].mxu0  ;;  %v1514_v17 = vpop.f32.mrb[4].mxu1 }
 0x118   :  { %v1496_v15 = vpop.f32.mrb[7].mxu0  ;;  %v1515_v19 = vpop.f32.mrb[5].mxu1 }
 0x119   :  { %v1062_v16 = vadd.f32 %v1494_v13, %v1021_v8  ;;  %v1497_v18 = vadd.f32 %v1496_v15, %v1495_v14  ;;  %v1516_v21 = vadd.f32 %v1515_v19, %v1514_v17  ;;  %v1517_v22 = vpop.f32.mrb[6].mxu1 }
 0x11a   :  { %v1518_v23 = vpop.f32.mrb[7].mxu1 }
 0x11b   :  { %v1065_v20 = vadd.f32 %v1497_v18, %v1024_v10  ;;  %v1103_v24 = vadd.f32 %v1516_v21, %v1062_v16  ;;  %v1519_v25 = vadd.f32 %v1518_v23, %v1517_v22 }
 0x11d   :  { %v1106_v26 = vadd.f32 %v1519_v25, %v1065_v20 }
 0x135   :  { %v1536_v27 = vpop.f32.mrb[8].mxu0 }
 0x136   :  { %v1537_v28 = vpop.f32.mrb[9].mxu0 }
 0x137   :  { %v1538_v29 = vadd.f32 %v1537_v28, %v1536_v27  ;;  %v1539_v30 = vpop.f32.mrb[10].mxu0  ;;  %v1558_v31 = vpop.f32.mrb[8].mxu1 }
 0x138   :  { %v1540_v32 = vpop.f32.mrb[11].mxu0  ;;  %v1559_v35 = vpop.f32.mrb[9].mxu1 }
 0x139   :  { %v1144_v33 = vadd.f32 %v1538_v29, %v1103_v24  ;;  %v1541_v34 = vadd.f32 %v1540_v32, %v1539_v30  ;;  %v1560_v36 = vadd.f32 %v1559_v35, %v1558_v31  ;;  %v1561_v37 = vpop.f32.mrb[10].mxu1 }
 0x13a   :  { %v1562_v39 = vpop.f32.mrb[11].mxu1 }
 0x13b   :  { %v1147_v38 = vadd.f32 %v1541_v34, %v1106_v26  ;;  %v1563_v40 = vadd.f32 %v1562_v39, %v1561_v37  ;;  %v1185_v41 = vadd.f32 %v1560_v36, %v1144_v33 }
 0x13d   :  { %v1188_v42 = vadd.f32 %v1563_v40, %v1147_v38 }
 0x155   :  { %v1225_v45 = vpop.f32.mrb[12].mxu0 }
 0x156   :  { %v1226_v46 = vadd.f32 %v1225_v45, %v1185_v41  ;;  %v1591_v47 = vpop.f32.mrb[13].mxu0 }
 0x157   :  { %v1228_v48 = vpop.f32.mrb[14].mxu0 }
 0x158   :  { %v1229_v49 = vadd.f32 %v1228_v48, %v1188_v42  ;;  %v1592_v50 = vpop.f32.mrb[15].mxu0  ;;  %v1235_v51 = vsel %vm1234_vm1, %v1226_v46, 0.0 }
 0x159   :  { %1237 = vadd.xlane.f32.xlu1 %v1235_v51 }
 0x15a   :  { %v1236_v52 = vsel %vm1234_vm1, %v1229_v49, 0.0 }
 0x15d   :  { %1239 = vadd.xlane.f32.xlu1 %v1236_v52 }
 0x16e   :  { %1266 = vperm.xlu1 %1597, %v1262_v53  }
 0x172   :  { %1271 = vperm.xlu1 %1597, %v1263_v54  }
 0x176   :  { %1280 = vperm.xlu1 %1597, %v1276_v55  }
 0x1e6   :  { %v1238_v56 = vpop.xlane.xlu1 %1237 }
 0x1e7   :  { %v1242_v57 = vmul.f32 0.010204081, %v1238_v56 }
 0x1e9   :  { %v1244_v58 = vsub.f32 %v1226_v46, %v1242_v57 }
 0x1ea   :  { %v1240_v59 = vpop.xlane.xlu1 %1239 }
 0x1eb   :  { %v1243_v60 = vmul.f32 0.010204081, %v1240_v59  ;;  %v1246_v61 = vsel %vm1234_vm1, %v1244_v58, 0.0 }
 0x1ec   :  { %v1248_v62 = vmul.f32 %v1246_v61, %v1246_v61 }
 0x1ed   :  { %v1245_v63 = vsub.f32 %v1229_v49, %v1243_v60 }
 0x1ee   :  { %1250 = vadd.xlane.f32.xlu0 %v1248_v62  ;;  %v1267_v3 = vpop.permute.xlu1 %1266 }
 0x1ef   :  { %v1247_v0 = vsel %vm1234_vm1, %v1245_v63, 0.0 }
 0x1f0   :  { %v1249_v1 = vmul.f32 %v1247_v0, %v1247_v0 }
 0x1f2   :  { %1252 = vadd.xlane.f32.xlu1 %v1249_v1  ;;  %v1272_v4 = vpop.permute.xlu1 %1271 }
 0x1f6   :  { %v1281_v5 = vpop.permute.xlu1 %1280 }
 0x203   :  { %1285 = vperm.xlu1 %1597, %v1277_v2  }
 0x27b   :  { %v1251_v6 = vpop.xlane.xlu0 %1250 }
 0x27c   :  { %v1254_v7 = vmul.f32 0.010204081, %v1251_v6 }
 0x27e   :  { %v1256_v8 = vadd.f32 1e-05, %v1254_v7 }
 0x27f   :  { %v1253_v9 = vpop.xlane.xlu1 %1252 }
 0x280   :  { %1721 = vrsqrt.f32 %v1256_v8  ;;  %v1255_v10 = vmul.f32 0.010204081, %v1253_v9 }
 0x282   :  { %v1257_v11 = vadd.f32 1e-05, %v1255_v10 }
 0x283   :  { %v1286_v19 = vpop.permute.xlu1 %1285 }
 0x284   :  { %1723 = vrsqrt.f32 %v1257_v11 }
 0x28a   :  { %v1722_v12 = vpop.eup %1721 }
 0x28b   :  { %v1260_v13 = vmul.f32 %v1722_v12, %v1244_v58 }
 0x28d   :  { %v1274_v14 = vmul.f32 %v1267_v3, %v1260_v13 }
 0x28e   :  { %v1724_v15 = vpop.eup %1723 }
 0x28f   :  { %v1261_v16 = vmul.f32 %v1724_v15, %v1245_v63  ;;  %v1288_v18 = vadd.f32 %v1281_v5, %v1274_v14 }
 0x291   :  { %v1275_v17 = vmul.f32 %v1272_v4, %v1261_v16  ;;  %v1290_v21 = vmax.f32 %v1288_v18, 0.0 }
 0x293   :  { %v1289_v20 = vadd.f32 %v1286_v19, %v1275_v17 }
 0x295   :  { %v1291_v22 = vmax.f32 %v1289_v20, 0.0 }
 0x297   :  { %v1430_v23 = vpack.c.bf16 %v1291_v22, %v1290_v21 }
 0x299   :  { %1431 = vst [vmem:[%s2139_s5] sm:$0xff] %v1430_v23  }

// kernel: generator_forward.4
= control target key start
LH: loop header
LB: loop body
LE: loop exit
PB: predicated region body
PF: predicated region fallthrough
CT: control target
= control target key end

     0   :  { %v852_v1 = vmov 0   ;;  %s1115_s1 = inlined_call_operand.vmem [shape: bf16[256,512], index: 1, kind: input, shape index: {}]   ;;  %s1116_s0 = inlined_call_operand.vmem [shape: bf16[16,256], index: 0, kind: input, shape index: {}]   ;;  %s1117_s2 = inlined_call_operand.vmem [shape: f32[16,1], index: 2, kind: input, shape index: {}]   ;;  %s1118_s3 = inlined_call_operand.vmem [shape: f32[16,1], index: 3, kind: input, shape index: {}]   ;;  %s1119_s4 = inlined_call_operand.vmem [shape: f32[16,1], index: 4, kind: input, shape index: {}]   ;;  %s1120_s5 = inlined_call_operand.vmem [shape: bf16[16,512], index: 5, kind: output, shape index: {}]  }
   0x1   :  { %v749_v0 = vld [vmem:[%s1115_s1 + $0x4] ss:$16 sps:$4 sm:$0xff]   ;;  %747 = vset.pattern.permute.xlu0 %v852_v1  ;;  %748 = vset.pattern.permute.xlu1 %v852_v1  ;;  %v751_v2 = vld [vmem:[%s1115_s1 + $0xc] ss:$16 sps:$4 sm:$0xff]   ;;  %v753_v3 = vld [vmem:[%s1115_s1] ss:$16 sps:$4 sm:$0xff]  }
   0x2   :  { %428 = vmatprep.subr.bf16.mxu0 %v749_v0  ;;  %v754_v4 = vld [vmem:[%s1115_s1 + $0x8] ss:$16 sps:$4 sm:$0xff]   ;;  %471 = vmatprep.subr.bf16.mxu1 %v751_v2  ;;  %v755_v5 = vld [vmem:[%s1115_s1 + $0x24] ss:$16 sps:$4 sm:$0xff]   ;;  %v757_v6 = vld [vmem:[%s1115_s1 + $0x2c] ss:$16 sps:$4 sm:$0xff]  }
   0x3   :  { %429 = vmatpush1.bf16.msra.mxu0 %v753_v3  ;;  %472 = vmatpush1.bf16.msra.mxu1 %v754_v4  ;;  %v759_v7 = vld [vmem:[%s1115_s1 + $0x20] ss:$16 sps:$4 sm:$0xff]   ;;  %v760_v8 = vld [vmem:[%s1115_s1 + $0x28] ss:$16 sps:$4 sm:$0xff]   ;;  %v761_v9 = vld [vmem:[%s1115_s1 + $0x44] ss:$16 sps:$4 sm:$0xff]  }
   0x4   :  { %430 = vmatprep.subr.bf16.mxu0 %v755_v5  ;;  %473 = vmatprep.subr.bf16.mxu1 %v757_v6  ;;  %v763_v10 = vld [vmem:[%s1115_s1 + $0x4c] ss:$16 sps:$4 sm:$0xff]   ;;  %v765_v11 = vld [vmem:[%s1115_s1 + $0x40] ss:$16 sps:$4 sm:$0xff]   ;;  %v766_v12 = vld [vmem:[%s1115_s1 + $0x48] ss:$16 sps:$4 sm:$0xff]   ;;  %v514_v5 = vlaneseq }
   0x5   :  { %v767_v13 = vld [vmem:[%s1115_s1 + $0x64] ss:$16 sps:$4 sm:$0xff]   ;;  %v769_v14 = vld [vmem:[%s1115_s1 + $0x6c] ss:$16 sps:$4 sm:$0xff]   ;;  %v771_v15 = vld [vmem:[%s1115_s1 + $0x60] ss:$16 sps:$4 sm:$0xff]  }
   0x6   :  { %v772_v16 = vld [vmem:[%s1115_s1 + $0x68] ss:$16 sps:$4 sm:$0xff]   ;;  %v773_v17 = vld [vmem:[%s1115_s1 + $0x84] ss:$16 sps:$4 sm:$0xff]   ;;  %v775_v18 = vld [vmem:[%s1115_s1 + $0x8c] ss:$16 sps:$4 sm:$0xff]  }
   0x7   :  { %431 = vmatpush1.bf16.msra.mxu0 %v759_v7  ;;  %474 = vmatpush1.bf16.msra.mxu1 %v760_v8  ;;  %v777_v19 = vld [vmem:[%s1115_s1 + $0x80] ss:$16 sps:$4 sm:$0xff]   ;;  %v778_v20 = vld [vmem:[%s1115_s1 + $0x88] ss:$16 sps:$4 sm:$0xff]   ;;  %v779_v21 = vld [vmem:[%s1115_s1 + $0xa4] ss:$16 sps:$4 sm:$0xff]  }
   0x8   :  { %432 = vmatprep.subr.bf16.mxu0 %v761_v9  ;;  %475 = vmatprep.subr.bf16.mxu1 %v763_v10  ;;  %v781_v22 = vld [vmem:[%s1115_s1 + $0xac] ss:$16 sps:$4 sm:$0xff]   ;;  %v783_v23 = vld [vmem:[%s1115_s1 + $0xa0] ss:$16 sps:$4 sm:$0xff]   ;;  %v784_v24 = vld [vmem:[%s1115_s1 + $0xa8] ss:$16 sps:$4 sm:$0xff]  }
   0x9   :  { %v785_v25 = vld [vmem:[%s1115_s1 + $0xc4] ss:$16 sps:$4 sm:$0xff]   ;;  %v787_v26 = vld [vmem:[%s1115_s1 + $0xcc] ss:$16 sps:$4 sm:$0xff]   ;;  %v789_v27 = vld [vmem:[%s1115_s1 + $0xc0] ss:$16 sps:$4 sm:$0xff]  }
   0xa   :  { %v790_v28 = vld [vmem:[%s1115_s1 + $0xc8] ss:$16 sps:$4 sm:$0xff]   ;;  %v791_v29 = vld [vmem:[%s1115_s1 + $0xe4] ss:$16 sps:$4 sm:$0xff]   ;;  %v793_v30 = vld [vmem:[%s1115_s1 + $0xec] ss:$16 sps:$4 sm:$0xff]  }
   0xb   :  { %433 = vmatpush1.bf16.msra.mxu0 %v765_v11  ;;  %476 = vmatpush1.bf16.msra.mxu1 %v766_v12  ;;  %v795_v31 = vld [vmem:[%s1115_s1 + $0xe0] ss:$16 sps:$4 sm:$0xff]   ;;  %v796_v32 = vld [vmem:[%s1115_s1 + $0xe8] ss:$16 sps:$4 sm:$0xff]   ;;  %v797_v33 = vld [vmem:[%s1115_s1 + $0x104] ss:$16 sps:$4 sm:$0xff]  }
   0xc   :  { %434 = vmatprep.subr.bf16.mxu0 %v767_v13  ;;  %477 = vmatprep.subr.bf16.mxu1 %v769_v14  ;;  %v799_v34 = vld [vmem:[%s1115_s1 + $0x10c] ss:$16 sps:$4 sm:$0xff]   ;;  %v801_v35 = vld [vmem:[%s1115_s1 + $0x100] ss:$16 sps:$4 sm:$0xff]   ;;  %v802_v36 = vld [vmem:[%s1115_s1 + $0x108] ss:$16 sps:$4 sm:$0xff]  }
   0xd   :  { %v803_v37 = vld [vmem:[%s1115_s1 + $0x124] ss:$16 sps:$4 sm:$0xff]   ;;  %v805_v38 = vld [vmem:[%s1115_s1 + $0x12c] ss:$16 sps:$4 sm:$0xff]   ;;  %v807_v39 = vld [vmem:[%s1115_s1 + $0x120] ss:$16 sps:$4 sm:$0xff]  }
   0xe   :  { %v808_v40 = vld [vmem:[%s1115_s1 + $0x128] ss:$16 sps:$4 sm:$0xff]   ;;  %v809_v41 = vld [vmem:[%s1115_s1 + $0x144] ss:$16 sps:$4 sm:$0xff]   ;;  %v811_v42 = vld [vmem:[%s1115_s1 + $0x14c] ss:$16 sps:$4 sm:$0xff]  }
   0xf   :  { %435 = vmatpush1.bf16.msra.mxu0 %v771_v15  ;;  %478 = vmatpush1.bf16.msra.mxu1 %v772_v16  ;;  %v813_v43 = vld [vmem:[%s1115_s1 + $0x140] ss:$16 sps:$4 sm:$0xff]   ;;  %v814_v44 = vld [vmem:[%s1115_s1 + $0x148] ss:$16 sps:$4 sm:$0xff]   ;;  %v815_v45 = vld [vmem:[%s1115_s1 + $0x164] ss:$16 sps:$4 sm:$0xff]  }
  0x10   :  { %436 = vmatprep.subr.bf16.mxu0 %v773_v17  ;;  %479 = vmatprep.subr.bf16.mxu1 %v775_v18  ;;  %v817_v46 = vld [vmem:[%s1115_s1 + $0x16c] ss:$16 sps:$4 sm:$0xff]   ;;  %v819_v48 = vld [vmem:[%s1115_s1 + $0x160] ss:$16 sps:$4 sm:$0xff]   ;;  %v820_v49 = vld [vmem:[%s1115_s1 + $0x168] ss:$16 sps:$4 sm:$0xff]  }
  0x11   :  { %v847_v47 = vld [vmem:[%s1116_s0 + $0x4] ss:$8 sps:$4 sm:$0xff]   ;;  %v825_v53 = vld [vmem:[%s1115_s1 + $0x180] ss:$16 sps:$4 sm:$0xff]   ;;  %v826_v54 = vld [vmem:[%s1115_s1 + $0x188] ss:$16 sps:$4 sm:$0xff]  }
  0x12   :  { %v86_v50 = vld [vmem:[%s1117_s2] sm:$0xff]  ;;  %v823_v52 = vld [vmem:[%s1115_s1 + $0x18c] ss:$16 sps:$4 sm:$0xff]   ;;  %460 = vmatprep.mubr.bf16.mxu0 %v847_v47  ;;  %503 = vmatprep.mubr.bf16.mxu1 %v847_v47  ;;  %v832_v59 = vld [vmem:[%s1115_s1 + $0x1a8] ss:$16 sps:$4 sm:$0xff]   ;;  %v515_v7 = vand.u32 127, %v514_v5 }
  0x13   :  { %437 = vmatpush1.bf16.msra.mxu0 %v777_v19  ;;  %480 = vmatpush1.bf16.msra.mxu1 %v778_v20  ;;  %v821_v51 = vld [vmem:[%s1115_s1 + $0x184] ss:$16 sps:$4 sm:$0xff]   ;;  %v87_v55 = vld [vmem:[%s1117_s2 + $0x8] sm:$0xff]  ;;  %v831_v58 = vld [vmem:[%s1115_s1 + $0x1a0] ss:$16 sps:$4 sm:$0xff]  }
  0x14   :  { %438 = vmatprep.subr.bf16.mxu0 %v779_v21  ;;  %481 = vmatprep.subr.bf16.mxu1 %v781_v22  ;;  %v827_v56 = vld [vmem:[%s1115_s1 + $0x1a4] ss:$16 sps:$4 sm:$0xff]   ;;  %v829_v57 = vld [vmem:[%s1115_s1 + $0x1ac] ss:$16 sps:$4 sm:$0xff]   ;;  %v837_v62 = vld [vmem:[%s1115_s1 + $0x1c0] ss:$16 sps:$4 sm:$0xff]  }
  0x15   :  { %90 = vperm.xlu0 %747, %v86_v50   ;;  %v833_v60 = vld [vmem:[%s1115_s1 + $0x1c4] ss:$16 sps:$4 sm:$0xff]   ;;  %v835_v61 = vld [vmem:[%s1115_s1 + $0x1cc] ss:$16 sps:$4 sm:$0xff]   ;;  %v838_v63 = vld [vmem:[%s1115_s1 + $0x1c8] ss:$16 sps:$4 sm:$0xff]  }
  0x16   :  { %v839_v0 = vld [vmem:[%s1115_s1 + $0x1e4] ss:$16 sps:$4 sm:$0xff]   ;;  %v841_v1 = vld [vmem:[%s1115_s1 + $0x1ec] ss:$16 sps:$4 sm:$0xff]   ;;  %v843_v2 = vld [vmem:[%s1115_s1 + $0x1e0] ss:$16 sps:$4 sm:$0xff]  }
  0x17   :  { %439 = vmatpush1.bf16.msra.mxu0 %v783_v23  ;;  %482 = vmatpush1.bf16.msra.mxu1 %v784_v24  ;;  %v844_v3 = vld [vmem:[%s1115_s1 + $0x1e8] ss:$16 sps:$4 sm:$0xff]   ;;  %v518_v11 = vadd.s32 384, %v515_v7 }
  0x18   :  { %440 = vmatprep.subr.bf16.mxu0 %v785_v25  ;;  %483 = vmatprep.subr.bf16.mxu1 %v787_v26  ;;  %v845_v4 = vld [vmem:[%s1116_s0] ss:$8 sps:$4 sm:$0xff]  }
  0x19   :  { %95 = vperm.xlu0 %747, %v87_v55   ;;  %vm522_vm0 = vcmp.lt.s32.totalorder %v518_v11, 392 }
  0x1b   :  { %441 = vmatpush1.bf16.msra.mxu0 %v789_v27  ;;  %484 = vmatpush1.bf16.msra.mxu1 %v790_v28 }
  0x1c   :  { %442 = vmatprep.subr.bf16.mxu0 %v791_v29  ;;  %485 = vmatprep.subr.bf16.mxu1 %v793_v30 }
  0x1f   :  { %443 = vmatpush1.bf16.msra.mxu0 %v795_v31  ;;  %486 = vmatpush1.bf16.msra.mxu1 %v796_v32 }
  0x20   :  { %444 = vmatprep.subr.bf16.mxu0 %v797_v33  ;;  %487 = vmatprep.subr.bf16.mxu1 %v799_v34  ;;  %v592_v34 = vld [vmem:[%s1118_s3] sm:$0xff] }
  0x23   :  { %445 = vmatpush1.bf16.msra.mxu0 %v801_v35  ;;  %488 = vmatpush1.bf16.msra.mxu1 %v802_v36  ;;  %v593_v35 = vld [vmem:[%s1118_s3 + $0x8] sm:$0xff]  ;;  %v612_v36 = vld [vmem:[%s1119_s4] sm:$0xff] }
  0x24   :  { %446 = vmatprep.subr.bf16.mxu0 %v803_v37  ;;  %489 = vmatprep.subr.bf16.mxu1 %v805_v38 }
  0x27   :  { %447 = vmatpush1.bf16.msra.mxu0 %v807_v39  ;;  %490 = vmatpush1.bf16.msra.mxu1 %v808_v40 }
  0x28   :  { %448 = vmatprep.subr.bf16.mxu0 %v809_v41  ;;  %491 = vmatprep.subr.bf16.mxu1 %v811_v42 }
  0x2b   :  { %449 = vmatpush1.bf16.msra.mxu0 %v813_v43  ;;  %492 = vmatpush1.bf16.msra.mxu1 %v814_v44 }
  0x2c   :  { %450 = vmatprep.subr.bf16.mxu0 %v815_v45  ;;  %493 = vmatprep.subr.bf16.mxu1 %v817_v46 }
  0x2f   :  { %451 = vmatpush1.bf16.msra.mxu0 %v819_v48  ;;  %494 = vmatpush1.bf16.msra.mxu1 %v820_v49 }
  0x30   :  { %452 = vmatprep.subr.bf16.mxu0 %v821_v51  ;;  %495 = vmatprep.subr.bf16.mxu1 %v823_v52 }
  0x33   :  { %453 = vmatpush1.bf16.msra.mxu0 %v825_v53  ;;  %496 = vmatpush1.bf16.msra.mxu1 %v826_v54 }
  0x34   :  { %454 = vmatprep.subr.bf16.mxu0 %v827_v56  ;;  %497 = vmatprep.subr.bf16.mxu1 %v829_v57 }
  0x37   :  { %455 = vmatpush1.bf16.msra.mxu0 %v831_v58  ;;  %498 = vmatpush1.bf16.msra.mxu1 %v832_v59 }
  0x38   :  { %456 = vmatprep.subr.bf16.mxu0 %v833_v60  ;;  %499 = vmatprep.subr.bf16.mxu1 %v835_v61 }
  0x3b   :  { %457 = vmatpush1.bf16.msra.mxu0 %v837_v62  ;;  %500 = vmatpush1.bf16.msra.mxu1 %v838_v63 }
  0x3c   :  { %458 = vmatprep.subr.bf16.mxu0 %v839_v0  ;;  %501 = vmatprep.subr.bf16.mxu1 %v841_v1  ;;  %v613_v1 = vld [vmem:[%s1119_s4 + $0x8] sm:$0xff] }
  0x3f   :  { %459 = vmatpush1.bf16.msra.mxu0 %v843_v2  ;;  %502 = vmatpush1.bf16.msra.mxu1 %v844_v3 }
  0x42   :  { %461 = vmatmul.mubr.bf16.vlgmr.msra.gmra.mrb[0].mxu0 %v845_v4  ;;  %504 = vmatmul.mubr.bf16.vlgmr.msra.gmra.mrb[0].mxu1 %v845_v4 }
  0x94   :  { %v91_v6 = vpop.permute.xlu0 %90 }
  0x98   :  { %v96_v8 = vpop.permute.xlu0 %95 }
 0x115   :  { %v462_v9 = vpop.f32.mrb[0].mxu0  ;;  %v505_v10 = vpop.f32.mrb[0].mxu1 }
 0x116   :  { %v463_v12 = vadd.f32 %v462_v9, %v91_v6  ;;  %v464_v13 = vpop.f32.mrb[1].mxu0  ;;  %v507_v14 = vpop.f32.mrb[1].mxu1  ;;  %v506_v22 = vadd.f32 %v505_v10, %v91_v6 }
 0x117   :  { %v465_v15 = vadd.f32 %v464_v13, %v91_v6  ;;  %v466_v16 = vpop.f32.mrb[2].mxu0  ;;  %v509_v17 = vpop.f32.mrb[2].mxu1  ;;  %v508_v18 = vadd.f32 %v507_v14, %v91_v6 }
 0x118   :  { %v467_v19 = vadd.f32 %v466_v16, %v96_v8  ;;  %v468_v20 = vpop.f32.mrb[3].mxu0  ;;  %v511_v21 = vpop.f32.mrb[3].mxu1  ;;  %v510_v25 = vadd.f32 %v509_v17, %v96_v8 }
 0x119   :  { %v531_v23 = vadd.f32 %v465_v15, %v463_v12  ;;  %v469_v24 = vadd.f32 %v468_v20, %v96_v8  ;;  %v512_v28 = vadd.f32 %v511_v21, %v96_v8  ;;  %v526_v29 = vsel %vm522_vm0, %v508_v18, 0.0 }
 0x11b   :  { %v536_v26 = vadd.f32 %v469_v24, %v467_v19  ;;  %v532_v27 = vadd.f32 %v531_v23, %v506_v22  ;;  %v530_v32 = vsel %vm522_vm0, %v512_v28, 0.0 }
 0x11d   :  { %v533_v30 = vadd.f32 %v532_v27, %v526_v29  ;;  %v537_v31 = vadd.f32 %v536_v26, %v510_v25 }
 0x11f   :  { %534 = vadd.xlane.f32.xlu1 %v533_v30  ;;  %v538_v33 = vadd.f32 %v537_v31, %v530_v32 }
 0x123   :  { %539 = vadd.xlane.f32.xlu1 %v538_v33 }
 0x134   :  { %596 = vperm.xlu1 %748, %v592_v34  }
 0x138   :  { %601 = vperm.xlu1 %748, %v593_v35  }
 0x13c   :  { %616 = vperm.xlu1 %748, %v612_v36  }
 0x1ac   :  { %v535_v37 = vpop.xlane.xlu1 %534 }
 0x1ad   :  { %v542_v38 = vmul.f32 0.0025510204, %v535_v37 }
 0x1af   :  { %v544_v39 = vsub.f32 %v463_v12, %v542_v38  ;;  %v545_v40 = vsub.f32 %v465_v15, %v542_v38  ;;  %v546_v41 = vsub.f32 %v506_v22, %v542_v38  ;;  %v547_v42 = vsub.f32 %v508_v18, %v542_v38 }
 0x1b0   :  { %v540_v43 = vpop.xlane.xlu1 %539 }
 0x1b1   :  { %v543_v44 = vmul.f32 0.0025510204, %v540_v43  ;;  %v560_v45 = vmul.f32 %v544_v39, %v544_v39  ;;  %v561_v46 = vmul.f32 %v545_v40, %v545_v40  ;;  %v555_v47 = vsel %vm522_vm0, %v547_v42, 0.0 }
 0x1b2   :  { %v562_v48 = vmul.f32 %v546_v41, %v546_v41  ;;  %v563_v54 = vmul.f32 %v555_v47, %v555_v47 }
 0x1b3   :  { %v548_v49 = vsub.f32 %v467_v19, %v543_v44  ;;  %v549_v50 = vsub.f32 %v469_v24, %v543_v44  ;;  %v568_v51 = vadd.f32 %v561_v46, %v560_v45  ;;  %v550_v52 = vsub.f32 %v510_v25, %v543_v44 }
 0x1b4   :  { %v551_v53 = vsub.f32 %v512_v28, %v543_v44  ;;  %v597_v2 = vpop.permute.xlu1 %596 }
 0x1b5   :  { %v569_v55 = vadd.f32 %v568_v51, %v562_v48  ;;  %v564_v56 = vmul.f32 %v548_v49, %v548_v49  ;;  %v565_v57 = vmul.f32 %v549_v50, %v549_v50  ;;  %v566_v60 = vmul.f32 %v550_v52, %v550_v52 }
 0x1b6   :  { %v559_v58 = vsel %vm522_vm0, %v551_v53, 0.0 }
 0x1b7   :  { %v570_v59 = vadd.f32 %v569_v55, %v563_v54  ;;  %v573_v61 = vadd.f32 %v565_v57, %v564_v56  ;;  %v567_v62 = vmul.f32 %v559_v58, %v559_v58 }
 0x1b8   :  { %v602_v3 = vpop.permute.xlu1 %601 }
 0x1b9   :  { %571 = vadd.xlane.f32.xlu0 %v570_v59  ;;  %v574_v63 = vadd.f32 %v573_v61, %v566_v60 }
 0x1bb   :  { %v575_v0 = vadd.f32 %v574_v63, %v567_v62 }
 0x1bc   :  { %v617_v4 = vpop.permute.xlu1 %616 }
 0x1bd   :  { %576 = vadd.xlane.f32.xlu1 %v575_v0 }
 0x1ce   :  { %621 = vperm.xlu1 %748, %v613_v1  }
 0x246   :  { %v572_v5 = vpop.xlane.xlu0 %571 }
 0x247   :  { %v578_v6 = vmul.f32 0.0025510204, %v572_v5 }
 0x249   :  { %v580_v7 = vadd.f32 1e-05, %v578_v6 }
 0x24a   :  { %v577_v8 = vpop.xlane.xlu1 %576 }
 0x24b   :  { %848 = vrsqrt.f32 %v580_v7  ;;  %v579_v9 = vmul.f32 0.0025510204, %v577_v8 }
 0x24d   :  { %v581_v10 = vadd.f32 1e-05, %v579_v9 }
 0x24e   :  { %v622_v37 = vpop.permute.xlu1 %621 }
 0x24f   :  { %850 = vrsqrt.f32 %v581_v10 }
 0x255   :  { %v849_v11 = vpop.eup %848 }
 0x256   :  { %v584_v12 = vmul.f32 %v849_v11, %v544_v39  ;;  %v585_v13 = vmul.f32 %v849_v11, %v545_v40  ;;  %v586_v14 = vmul.f32 %v849_v11, %v546_v41  ;;  %v587_v15 = vmul.f32 %v849_v11, %v547_v42 }
 0x258   :  { %v604_v16 = vmul.f32 %v597_v2, %v584_v12  ;;  %v605_v17 = vmul.f32 %v597_v2, %v585_v13  ;;  %v606_v18 = vmul.f32 %v597_v2, %v586_v14  ;;  %v607_v19 = vmul.f32 %v597_v2, %v587_v15 }
 0x259   :  { %v851_v20 = vpop.eup %850 }
 0x25a   :  { %v588_v21 = vmul.f32 %v851_v20, %v548_v49  ;;  %v589_v22 = vmul.f32 %v851_v20, %v549_v50  ;;  %v590_v23 = vmul.f32 %v851_v20, %v550_v52  ;;  %v591_v24 = vmul.f32 %v851_v20, %v551_v53 }
 0x25b   :  { %v624_v25 = vadd.f32 %v617_v4, %v604_v16  ;;  %v625_v26 = vadd.f32 %v617_v4, %v605_v17  ;;  %v626_v27 = vadd.f32 %v617_v4, %v606_v18  ;;  %v627_v28 = vadd.f32 %v617_v4, %v607_v19 }
 0x25c   :  { %v608_v29 = vmul.f32 %v602_v3, %v588_v21  ;;  %v609_v30 = vmul.f32 %v602_v3, %v589_v22  ;;  %v610_v31 = vmul.f32 %v602_v3, %v590_v23  ;;  %v611_v32 = vmul.f32 %v602_v3, %v591_v24 }
 0x25d   :  { %v632_v33 = vmax.f32 %v624_v25, 0.0  ;;  %v633_v34 = vmax.f32 %v625_v26, 0.0  ;;  %v634_v35 = vmax.f32 %v626_v27, 0.0  ;;  %v635_v36 = vmax.f32 %v627_v28, 0.0 }
 0x25e   :  { %v628_v38 = vadd.f32 %v622_v37, %v608_v29  ;;  %v629_v39 = vadd.f32 %v622_v37, %v609_v30  ;;  %v630_v40 = vadd.f32 %v622_v37, %v610_v31  ;;  %v631_v41 = vadd.f32 %v622_v37, %v611_v32 }
 0x25f   :  { %v742_v42 = vpack.c.bf16 %v633_v34, %v632_v33  ;;  %v743_v43 = vpack.c.bf16 %v635_v36, %v634_v35 }
 0x260   :  { %v636_v44 = vmax.f32 %v628_v38, 0.0  ;;  %v637_v45 = vmax.f32 %v629_v39, 0.0  ;;  %v638_v46 = vmax.f32 %v630_v40, 0.0  ;;  %v639_v47 = vmax.f32 %v631_v41, 0.0 }
 0x261   :  { %664 = vst [vmem:[%s1120_s5] sm:$0xff] %v742_v42  ;;  %665 = vst [vmem:[%s1120_s5 + $0x8] sm:$0xff] %v743_v43 }
 0x262   :  { %v744_v48 = vpack.c.bf16 %v637_v45, %v636_v44  ;;  %v745_v49 = vpack.c.bf16 %v639_v47, %v638_v46 }
 0x264   :  { %666 = vst [vmem:[%s1120_s5 + $0x10] sm:$0xff] %v744_v48  ;;  %667 = vst [vmem:[%s1120_s5 + $0x18] sm:$0xff] %v745_v49 }

// kernel: generator_forward.5
= control target key start
LH: loop header
LB: loop body
LE: loop exit
PB: predicated region body
PF: predicated region fallthrough
CT: control target
= control target key end

     0   :  { %s1322_s12 = smov 0   ;;  %s1324_s13 = smov 0   ;;  %s1625_s0 = inlined_call_operand.vmem [shape: bf16[16,128], index: 0, kind: input, shape index: {}]   ;;  %s1626_s1 = inlined_call_operand.vmem [shape: bf16[128,1792], index: 1, kind: input, shape index: {}]   ;;  %s1627_s2 = inlined_call_operand.vmem [shape: f32[16,1], index: 2, kind: input, shape index: {}]   ;;  %s1628_s3 = inlined_call_operand.vmem [shape: f32[16,1792], index: 3, kind: output, shape index: {}]  }
   0x1   :  { %s1326_s14 = smov 0  }
   0x2 LB: > { %s1006_s15 = sadd.s32 4294967295, %s1297_s14   ;;  %s1339_s16 = sadd.s32 1, %s1297_s14   ;;  %s1297_s14 = sphi %s1326_s14, %s1632_s14   ;;  %s1293_s13 = sphi %s1324_s13, %s1631_s13   ;;  %s1289_s12 = sphi %s1322_s12, %s1630_s12  }
   0x3   : > { %s38_s17 = ssub.s32 %s1297_s14, %s1339_s16  ;;  %s41_s18 = sadd.s32 1, %s1293_s13 }
   0x4   : > { %p39_p0 = scmp.eq.s32.totalorder %s38_s17, 0  ;;  %p48_p1 = scmp.ne.s32.totalorder %s1293_s13, %s1289_s12 }
   0x5   : > { %p49_p2 = scmp.eq.s32.totalorder %s1297_s14, 0  ;;  %p99_p3 = scmp.eq.s32.totalorder %s1006_s15, 1 }
   0x6   : > { %s1350_s19 = scalar_select %p39_p0, %s1293_s13, %s41_s18  }
   0x7   : > { %p50_p4 = por %p49_p2, %p48_p1  ;;  %p1352_p5 = por %p99_p3, %p48_p1 }
   0x8   : > { %p1009_p6 = scmp.ge.s32.totalorder %s1297_s14, 2 }
   0xa   : > { %127 = sbr.rel (%p1009_p6) target bundleno = 56 (0x38), region = 24 }
  0x11   : > { %130 = sbr.rel (!%p50_p4) target bundleno = 56 (0x38), region = 28  ;;  %s132_s21 = sand.u32 (%p50_p4), 1, %s1293_s13  }
  0x12   : > { %s1104_s22 = smul.u32 (%p50_p4), 28, %s1297_s14 }
  0x13   : > { %s1135_s23 = smul.u32 (%p50_p4), 448, %s132_s21 }
  0x14   : > { %s1362_s26 = scalar_lea.vmem (%p50_p4), %s1626_s1, %s1104_s22 }
  0x15   : > { %v152_v0 = vld [vmem:[%s1362_s26] sm:$0xff] (%p50_p4)  ;;  %v154_v1 = vld [vmem:[%s1362_s26 + $0x8] sm:$0xff] (%p50_p4)  ;;  %v156_v2 = vld [vmem:[%s1362_s26 + $0x10] sm:$0xff] (%p50_p4)  ;;  %s1367_s27 = scalar_lea.vmem (%p50_p4), [#allocation2], %s1135_s23 }
  0x16   : > { %153 = vst [vmem:[%s1367_s27] sm:$0xff] (%p50_p4), %v152_v0  ;;  %155 = vst [vmem:[%s1367_s27 + $0x8] sm:$0xff] (%p50_p4), %v154_v1  ;;  %v158_v3 = vld [vmem:[%s1362_s26 + $0x38] sm:$0xff] (%p50_p4)  ;;  %v160_v4 = vld [vmem:[%s1362_s26 + $0x40] sm:$0xff] (%p50_p4) }
  0x17   : > { %157 = vst [vmem:[%s1367_s27 + $0x10] sm:$0xff] (%p50_p4), %v156_v2  ;;  %v162_v5 = vld [vmem:[%s1362_s26 + $0x48] sm:$0xff] (%p50_p4)  ;;  %159 = vst [vmem:[%s1367_s27 + $0x1c] sm:$0xff] (%p50_p4), %v158_v3  ;;  %v164_v6 = vld [vmem:[%s1362_s26 + $0x70] sm:$0xff] (%p50_p4) }
  0x18   : > { %161 = vst [vmem:[%s1367_s27 + $0x24] sm:$0xff] %v160_v4  ;;  %163 = vst [vmem:[%s1367_s27 + $0x2c] sm:$0xff] %v162_v5  ;;  %v166_v7 = vld [vmem:[%s1362_s26 + $0x78] sm:$0xff]  ;;  %v168_v8 = vld [vmem:[%s1362_s26 + $0x80] sm:$0xff] }
  0x19   : > { %165 = vst [vmem:[%s1367_s27 + $0x38] sm:$0xff] %v164_v6  ;;  %167 = vst [vmem:[%s1367_s27 + $0x40] sm:$0xff] %v166_v7  ;;  %v170_v9 = vld [vmem:[%s1362_s26 + $0xa8] sm:$0xff]  ;;  %v172_v10 = vld [vmem:[%s1362_s26 + $0xb0] sm:$0xff] }
  0x1a   : > { %169 = vst [vmem:[%s1367_s27 + $0x48] sm:$0xff] %v168_v8  ;;  %v174_v11 = vld [vmem:[%s1362_s26 + $0xb8] sm:$0xff]  ;;  %171 = vst [vmem:[%s1367_s27 + $0x54] sm:$0xff] %v170_v9  ;;  %v176_v12 = vld [vmem:[%s1362_s26 + $0xe0] sm:$0xff] }
  0x1b   : > { %173 = vst [vmem:[%s1367_s27 + $0x5c] sm:$0xff] %v172_v10  ;;  %175 = vst [vmem:[%s1367_s27 + $0x64] sm:$0xff] %v174_v11  ;;  %v178_v13 = vld [vmem:[%s1362_s26 + $0xe8] sm:$0xff]  ;;  %v180_v14 = vld [vmem:[%s1362_s26 + $0xf0] sm:$0xff] }
  0x1c   : > { %177 = vst [vmem:[%s1367_s27 + $0x70] sm:$0xff] %v176_v12  ;;  %179 = vst [vmem:[%s1367_s27 + $0x78] sm:$0xff] %v178_v13  ;;  %v182_v15 = vld [vmem:[%s1362_s26 + $0x118] sm:$0xff]  ;;  %v184_v16 = vld [vmem:[%s1362_s26 + $0x120] sm:$0xff] }
  0x1d   : > { %181 = vst [vmem:[%s1367_s27 + $0x80] sm:$0xff] %v180_v14  ;;  %v186_v17 = vld [vmem:[%s1362_s26 + $0x128] sm:$0xff]  ;;  %183 = vst [vmem:[%s1367_s27 + $0x8c] sm:$0xff] %v182_v15  ;;  %v188_v18 = vld [vmem:[%s1362_s26 + $0x150] sm:$0xff] }
  0x1e   : > { %185 = vst [vmem:[%s1367_s27 + $0x94] sm:$0xff] %v184_v16  ;;  %187 = vst [vmem:[%s1367_s27 + $0x9c] sm:$0xff] %v186_v17  ;;  %v190_v19 = vld [vmem:[%s1362_s26 + $0x158] sm:$0xff]  ;;  %v192_v20 = vld [vmem:[%s1362_s26 + $0x160] sm:$0xff] }
  0x1f   : > { %189 = vst [vmem:[%s1367_s27 + $0xa8] sm:$0xff] %v188_v18  ;;  %191 = vst [vmem:[%s1367_s27 + $0xb0] sm:$0xff] %v190_v19  ;;  %v194_v21 = vld [vmem:[%s1362_s26 + $0x188] sm:$0xff]  ;;  %v196_v22 = vld [vmem:[%s1362_s26 + $0x190] sm:$0xff] }
  0x20   : > { %193 = vst [vmem:[%s1367_s27 + $0xb8] sm:$0xff] %v192_v20  ;;  %v198_v23 = vld [vmem:[%s1362_s26 + $0x198] sm:$0xff]  ;;  %195 = vst [vmem:[%s1367_s27 + $0xc4] sm:$0xff] %v194_v21  ;;  %v200_v24 = vld [vmem:[%s1362_s26 + $0x1c0] sm:$0xff] }
  0x21   : > { %197 = vst [vmem:[%s1367_s27 + $0xcc] sm:$0xff] %v196_v22  ;;  %199 = vst [vmem:[%s1367_s27 + $0xd4] sm:$0xff] %v198_v23  ;;  %v202_v25 = vld [vmem:[%s1362_s26 + $0x1c8] sm:$0xff]  ;;  %v204_v26 = vld [vmem:[%s1362_s26 + $0x1d0] sm:$0xff] }
  0x22   : > { %201 = vst [vmem:[%s1367_s27 + $0xe0] sm:$0xff] %v200_v24  ;;  %203 = vst [vmem:[%s1367_s27 + $0xe8] sm:$0xff] %v202_v25  ;;  %v206_v27 = vld [vmem:[%s1362_s26 + $0x1f8] sm:$0xff]  ;;  %v208_v28 = vld [vmem:[%s1362_s26 + $0x200] sm:$0xff] }
  0x23   : > { %205 = vst [vmem:[%s1367_s27 + $0xf0] sm:$0xff] %v204_v26  ;;  %v210_v29 = vld [vmem:[%s1362_s26 + $0x208] sm:$0xff]  ;;  %207 = vst [vmem:[%s1367_s27 + $0xfc] sm:$0xff] %v206_v27  ;;  %v212_v30 = vld [vmem:[%s1362_s26 + $0x230] sm:$0xff] }
  0x24   : > { %209 = vst [vmem:[%s1367_s27 + $0x104] sm:$0xff] %v208_v28  ;;  %211 = vst [vmem:[%s1367_s27 + $0x10c] sm:$0xff] %v210_v29  ;;  %v214_v31 = vld [vmem:[%s1362_s26 + $0x238] sm:$0xff]  ;;  %v216_v32 = vld [vmem:[%s1362_s26 + $0x240] sm:$0xff] }
  0x25   : > { %213 = vst [vmem:[%s1367_s27 + $0x118] sm:$0xff] %v212_v30  ;;  %215 = vst [vmem:[%s1367_s27 + $0x120] sm:$0xff] %v214_v31  ;;  %v218_v33 = vld [vmem:[%s1362_s26 + $0x268] sm:$0xff]  ;;  %v220_v34 = vld [vmem:[%s1362_s26 + $0x270] sm:$0xff] }
  0x26   : > { %217 = vst [vmem:[%s1367_s27 + $0x128] sm:$0xff] %v216_v32  ;;  %v222_v35 = vld [vmem:[%s1362_s26 + $0x278] sm:$0xff]  ;;  %219 = vst [vmem:[%s1367_s27 + $0x134] sm:$0xff] %v218_v33  ;;  %v224_v36 = vld [vmem:[%s1362_s26 + $0x2a0] sm:$0xff] }
  0x27   : > { %221 = vst [vmem:[%s1367_s27 + $0x13c] sm:$0xff] %v220_v34  ;;  %223 = vst [vmem:[%s1367_s27 + $0x144] sm:$0xff] %v222_v35  ;;  %v226_v37 = vld [vmem:[%s1362_s26 + $0x2a8] sm:$0xff]  ;;  %v228_v38 = vld [vmem:[%s1362_s26 + $0x2b0] sm:$0xff] }
  0x28   : > { %225 = vst [vmem:[%s1367_s27 + $0x150] sm:$0xff] %v224_v36  ;;  %227 = vst [vmem:[%s1367_s27 + $0x158] sm:$0xff] %v226_v37  ;;  %v230_v39 = vld [vmem:[%s1362_s26 + $0x2d8] sm:$0xff]  ;;  %v232_v40 = vld [vmem:[%s1362_s26 + $0x2e0] sm:$0xff] }
  0x29   : > { %229 = vst [vmem:[%s1367_s27 + $0x160] sm:$0xff] %v228_v38  ;;  %v234_v41 = vld [vmem:[%s1362_s26 + $0x2e8] sm:$0xff]  ;;  %231 = vst [vmem:[%s1367_s27 + $0x16c] sm:$0xff] %v230_v39  ;;  %v236_v42 = vld [vmem:[%s1362_s26 + $0x310] sm:$0xff] }
  0x2a   : > { %233 = vst [vmem:[%s1367_s27 + $0x174] sm:$0xff] %v232_v40  ;;  %235 = vst [vmem:[%s1367_s27 + $0x17c] sm:$0xff] %v234_v41  ;;  %v238_v43 = vld [vmem:[%s1362_s26 + $0x318] sm:$0xff]  ;;  %v240_v44 = vld [vmem:[%s1362_s26 + $0x320] sm:$0xff] }
  0x2b   : > { %237 = vst [vmem:[%s1367_s27 + $0x188] sm:$0xff] %v236_v42  ;;  %239 = vst [vmem:[%s1367_s27 + $0x190] sm:$0xff] %v238_v43  ;;  %v242_v45 = vld [vmem:[%s1362_s26 + $0x348] sm:$0xff]  ;;  %v244_v46 = vld [vmem:[%s1362_s26 + $0x350] sm:$0xff] }
  0x2c   : > { %241 = vst [vmem:[%s1367_s27 + $0x198] sm:$0xff] %v240_v44  ;;  %v246_v47 = vld [vmem:[%s1362_s26 + $0x358] sm:$0xff]  ;;  %243 = vst [vmem:[%s1367_s27 + $0x1a4] sm:$0xff] %v242_v45  ;;  %v1013_v49 = vld [vmem:[%s1362_s26 + $0x50] sm:$0xf] }
  0x2d   : > { %245 = vst [vmem:[%s1367_s27 + $0x1ac] sm:$0xff] %v244_v46  ;;  %247 = vst [vmem:[%s1367_s27 + $0x1b4] sm:$0xff] %v246_v47  ;;  %v1011_v48 = vld [vmem:[%s1362_s26 + $0x18] sm:$0xf]  ;;  %v1015_v50 = vld [vmem:[%s1362_s26 + $0x88] sm:$0xf] }
  0x2e   : > { %1012 = vst [vmem:[%s1367_s27 + $0x18] sm:$0xf] %v1011_v48  ;;  %1014 = vst [vmem:[%s1367_s27 + $0x34] sm:$0xf] %v1013_v49  ;;  %v1017_v51 = vld [vmem:[%s1362_s26 + $0xc0] sm:$0xf] }
  0x2f   : > { %1016 = vst [vmem:[%s1367_s27 + $0x50] sm:$0xf] %v1015_v50  ;;  %v1019_v52 = vld [vmem:[%s1362_s26 + $0xf8] sm:$0xf]  ;;  %v1021_v53 = vld [vmem:[%s1362_s26 + $0x130] sm:$0xf] }
  0x30   : > { %1018 = vst [vmem:[%s1367_s27 + $0x6c] sm:$0xf] %v1017_v51  ;;  %1020 = vst [vmem:[%s1367_s27 + $0x88] sm:$0xf] %v1019_v52  ;;  %v1023_v54 = vld [vmem:[%s1362_s26 + $0x168] sm:$0xf] }
  0x31   : > { %1022 = vst [vmem:[%s1367_s27 + $0xa4] sm:$0xf] %v1021_v53  ;;  %v1025_v55 = vld [vmem:[%s1362_s26 + $0x1a0] sm:$0xf]  ;;  %v1027_v56 = vld [vmem:[%s1362_s26 + $0x1d8] sm:$0xf] }
  0x32   : > { %1024 = vst [vmem:[%s1367_s27 + $0xc0] sm:$0xf] %v1023_v54  ;;  %1026 = vst [vmem:[%s1367_s27 + $0xdc] sm:$0xf] %v1025_v55  ;;  %v1029_v57 = vld [vmem:[%s1362_s26 + $0x210] sm:$0xf] }
  0x33   : > { %1028 = vst [vmem:[%s1367_s27 + $0xf8] sm:$0xf] %v1027_v56  ;;  %v1031_v58 = vld [vmem:[%s1362_s26 + $0x248] sm:$0xf]  ;;  %v1033_v59 = vld [vmem:[%s1362_s26 + $0x280] sm:$0xf] }
  0x34   : > { %1030 = vst [vmem:[%s1367_s27 + $0x114] sm:$0xf] %v1029_v57  ;;  %1032 = vst [vmem:[%s1367_s27 + $0x130] sm:$0xf] %v1031_v58  ;;  %v1035_v60 = vld [vmem:[%s1362_s26 + $0x2b8] sm:$0xf] }
  0x35   : > { %1034 = vst [vmem:[%s1367_s27 + $0x14c] sm:$0xf] %v1033_v59  ;;  %v1037_v61 = vld [vmem:[%s1362_s26 + $0x2f0] sm:$0xf]  ;;  %v1039_v62 = vld [vmem:[%s1362_s26 + $0x328] sm:$0xf] }
  0x36   : > { %1036 = vst [vmem:[%s1367_s27 + $0x168] sm:$0xf] %v1035_v60  ;;  %1038 = vst [vmem:[%s1367_s27 + $0x184] sm:$0xf] %v1037_v61  ;;  %v1041_v63 = vld [vmem:[%s1362_s26 + $0x360] sm:$0xf] }
  0x37   : > { %1040 = vst [vmem:[%s1367_s27 + $0x1a0] sm:$0xf] %v1039_v62  ;;  %1042 = vst [vmem:[%s1367_s27 + $0x1bc] sm:$0xf] %v1041_v63 }
  0x38 PF: > { %p1043_p7 = scmp.ge.s32.totalorder %s1297_s14, 1  ;;  %p291_p8 = scmp.lt.s32.totalorder %s1297_s14, 3 }
  0x3a   : > { %p292_p9 = pnand %p1043_p7, %p291_p8 }
  0x3b   : > { %s298_s28 = sand.u32 (!%p292_p9), 1, %s1289_s12   ;;  %v1299_v0 = vmov (!%p292_p9), 0   ;;  %v389_v1 = vld [vmem:[%s1627_s2] sm:$0xff] (!%p292_p9)  ;;  %v390_v2 = vld [vmem:[%s1627_s2 + $0x8] sm:$0xff] (!%p292_p9)  ;;  %v1300_v39 = vmov (!%p292_p9), 0.0   ;;  %vm1301_vm0 = vmmov (!%p292_p9), 0  }
  0x3c   : > { %295 = sbr.rel (%p292_p9) target bundleno = 368 (0x170), region = 54  ;;  %727 = vmatprep.mubr.bf16.mxu0 (!%p292_p9), %v1299_v0  ;;  %770 = vmatprep.mubr.bf16.mxu1 (!%p292_p9), %v1299_v0  ;;  %v1546_v36 = vld [vmem:[%s1625_s0] sm:$0xff] (!%p292_p9)  }
  0x3d   : > { %s1136_s29 = smul.u32 (!%p292_p9), 448, %s298_s28  ;;  %1165 = vset.pattern.permute.xlu0 (!%p292_p9), %v1299_v0 }
  0x3e   : > { %393 = vperm.xlu0 (!%p292_p9), %1165, %v389_v1   ;;  %s1137_s10 = smul.u32 (!%p292_p9), 112, %s298_s28 }
  0x3f   : > { %s1508_s7 = scalar_lea.vmem (!%p292_p9), [#allocation2], %s1136_s29 }
  0x40   : > { %v1166_v3 = vld [vmem:[%s1508_s7 + $0x4] ss:$28 sps:$4 sm:$0xff] (!%p292_p9)   ;;  %v1168_v4 = vld [vmem:[%s1508_s7 + $0xc] ss:$28 sps:$4 sm:$0xff] (!%p292_p9)   ;;  %v1172_v7 = vld [vmem:[%s1508_s7 + $0x3c] ss:$28 sps:$4 sm:$0xff] (!%p292_p9)  }
  0x41   : > { %695 = vmatprep.subr.bf16.mxu0 (!%p292_p9), %v1166_v3  ;;  %v1170_v5 = vld [vmem:[%s1508_s7] ss:$28 sps:$4 sm:$0xff] (!%p292_p9)   ;;  %v1171_v6 = vld [vmem:[%s1508_s7 + $0x8] ss:$28 sps:$4 sm:$0xff] (!%p292_p9)   ;;  %738 = vmatprep.subr.bf16.mxu1 (!%p292_p9), %v1168_v4  ;;  %v1176_v9 = vld [vmem:[%s1508_s7 + $0x38] ss:$28 sps:$4 sm:$0xff] (!%p292_p9)  }
  0x42   : > { %398 = vperm.xlu0 (!%p292_p9), %1165, %v390_v2   ;;  %696 = vmatpush1.bf16.msra.mxu0 (!%p292_p9), %v1170_v5  ;;  %v1174_v8 = vld [vmem:[%s1508_s7 + $0x44] ss:$28 sps:$4 sm:$0xff] (!%p292_p9)   ;;  %v1178_v11 = vld [vmem:[%s1508_s7 + $0x74] ss:$28 sps:$4 sm:$0xff] (!%p292_p9)   ;;  %v1180_v12 = vld [vmem:[%s1508_s7 + $0x7c] ss:$28 sps:$4 sm:$0xff] (!%p292_p9)  }
  0x43   : > { %739 = vmatpush1.bf16.msra.mxu1 %v1171_v6  ;;  %697 = vmatprep.subr.bf16.mxu0 %v1172_v7  ;;  %v1177_v10 = vld [vmem:[%s1508_s7 + $0x40] ss:$28 sps:$4 sm:$0xff]   ;;  %v1182_v13 = vld [vmem:[%s1508_s7 + $0x70] ss:$28 sps:$4 sm:$0xff]   ;;  %v1183_v14 = vld [vmem:[%s1508_s7 + $0x78] ss:$28 sps:$4 sm:$0xff]  }
  0x44   : > { %740 = vmatprep.subr.bf16.mxu1 %v1174_v8  ;;  %v1184_v15 = vld [vmem:[%s1508_s7 + $0xac] ss:$28 sps:$4 sm:$0xff]   ;;  %v1186_v16 = vld [vmem:[%s1508_s7 + $0xb4] ss:$28 sps:$4 sm:$0xff]   ;;  %v1190_v19 = vld [vmem:[%s1508_s7 + $0xe4] ss:$28 sps:$4 sm:$0xff]  }
  0x45   : > { %v1188_v17 = vld [vmem:[%s1508_s7 + $0xa8] ss:$28 sps:$4 sm:$0xff]   ;;  %v1189_v18 = vld [vmem:[%s1508_s7 + $0xb0] ss:$28 sps:$4 sm:$0xff]   ;;  %v1194_v21 = vld [vmem:[%s1508_s7 + $0xe0] ss:$28 sps:$4 sm:$0xff]  }
  0x46   : > { %698 = vmatpush1.bf16.msra.mxu0 %v1176_v9  ;;  %v1192_v20 = vld [vmem:[%s1508_s7 + $0xec] ss:$28 sps:$4 sm:$0xff]   ;;  %v1196_v23 = vld [vmem:[%s1508_s7 + $0x11c] ss:$28 sps:$4 sm:$0xff]   ;;  %v1198_v24 = vld [vmem:[%s1508_s7 + $0x124] ss:$28 sps:$4 sm:$0xff]  }
  0x47   : > { %741 = vmatpush1.bf16.msra.mxu1 %v1177_v10  ;;  %699 = vmatprep.subr.bf16.mxu0 %v1178_v11  ;;  %v1195_v22 = vld [vmem:[%s1508_s7 + $0xe8] ss:$28 sps:$4 sm:$0xff]   ;;  %v1200_v25 = vld [vmem:[%s1508_s7 + $0x118] ss:$28 sps:$4 sm:$0xff]   ;;  %v1201_v26 = vld [vmem:[%s1508_s7 + $0x120] ss:$28 sps:$4 sm:$0xff]  }
  0x48   : > { %742 = vmatprep.subr.bf16.mxu1 %v1180_v12  ;;  %v1202_v27 = vld [vmem:[%s1508_s7 + $0x154] ss:$28 sps:$4 sm:$0xff]   ;;  %v1204_v28 = vld [vmem:[%s1508_s7 + $0x15c] ss:$28 sps:$4 sm:$0xff]   ;;  %v1208_v31 = vld [vmem:[%s1508_s7 + $0x18c] ss:$28 sps:$4 sm:$0xff]  }
  0x49   : > { %v1206_v29 = vld [vmem:[%s1508_s7 + $0x150] ss:$28 sps:$4 sm:$0xff]   ;;  %v1207_v30 = vld [vmem:[%s1508_s7 + $0x158] ss:$28 sps:$4 sm:$0xff]   ;;  %v1212_v33 = vld [vmem:[%s1508_s7 + $0x188] ss:$28 sps:$4 sm:$0xff]  }
  0x4a   : > { %700 = vmatpush1.bf16.msra.mxu0 %v1182_v13  ;;  %v1210_v32 = vld [vmem:[%s1508_s7 + $0x194] ss:$28 sps:$4 sm:$0xff]   ;;  %v1221_v40 = vld [vmem:[%s1508_s7 + $0x4c] ss:$28 sps:$4 sm:$0xff]   ;;  %v1225_v43 = vld [vmem:[%s1508_s7 + $0x84] ss:$28 sps:$4 sm:$0xff]  }
  0x4b   : > { %743 = vmatpush1.bf16.msra.mxu1 %v1183_v14  ;;  %701 = vmatprep.subr.bf16.mxu0 %v1184_v15  ;;  %v1213_v34 = vld [vmem:[%s1508_s7 + $0x190] ss:$28 sps:$4 sm:$0xff]   ;;  %v1218_v38 = vld [vmem:[%s1508_s7 + $0x18] ss:$28 sps:$4 sm:$0xff]   ;;  %v1219_v41 = vld [vmem:[%s1508_s7 + $0x48] ss:$28 sps:$4 sm:$0xff]  }
  0x4c   : > { %744 = vmatprep.subr.bf16.mxu1 %v1186_v16  ;;  %v1217_v35 = vld [vmem:[%s1508_s7 + $0x14] ss:$28 sps:$4 sm:$0xff]   ;;  %v1223_v44 = vld [vmem:[%s1508_s7 + $0x80] ss:$28 sps:$4 sm:$0xff]   ;;  %v1226_v45 = vld [vmem:[%s1508_s7 + $0x88] ss:$28 sps:$4 sm:$0xff]  }
  0x4d   : > { %v1215_v37 = vld [vmem:[%s1508_s7 + $0x10] ss:$28 sps:$4 sm:$0xff]   ;;  %v1229_v46 = vld [vmem:[%s1508_s7 + $0xbc] ss:$28 sps:$4 sm:$0xff]   ;;  %v1235_v53 = vld [vmem:[%s1508_s7 + $0x128] ss:$28 sps:$4 sm:$0xff]  }
  0x4e   : > { %702 = vmatpush1.bf16.msra.mxu0 %v1188_v17  ;;  %v1222_v42 = vld [vmem:[%s1508_s7 + $0x50] ss:$28 sps:$4 sm:$0xff]   ;;  %v1227_v47 = vld [vmem:[%s1508_s7 + $0xb8] ss:$28 sps:$4 sm:$0xff]   ;;  %v1230_v48 = vld [vmem:[%s1508_s7 + $0xc0] ss:$28 sps:$4 sm:$0xff]  }
  0x4f   : > { %745 = vmatpush1.bf16.msra.mxu1 %v1189_v18  ;;  %703 = vmatprep.subr.bf16.mxu0 %v1190_v19  ;;  %v1233_v49 = vld [vmem:[%s1508_s7 + $0xf4] ss:$28 sps:$4 sm:$0xff]   ;;  %v1237_v52 = vld [vmem:[%s1508_s7 + $0x12c] ss:$28 sps:$4 sm:$0xff]   ;;  %v1241_v55 = vld [vmem:[%s1508_s7 + $0x164] ss:$28 sps:$4 sm:$0xff]  }
  0x50   : > { %746 = vmatprep.subr.bf16.mxu1 %v1192_v20  ;;  %v1231_v50 = vld [vmem:[%s1508_s7 + $0xf0] ss:$28 sps:$4 sm:$0xff]   ;;  %v1234_v51 = vld [vmem:[%s1508_s7 + $0xf8] ss:$28 sps:$4 sm:$0xff]   ;;  %v1239_v56 = vld [vmem:[%s1508_s7 + $0x160] ss:$28 sps:$4 sm:$0xff]  }
  0x51   : > { %v1238_v54 = vld [vmem:[%s1508_s7 + $0x130] ss:$28 sps:$4 sm:$0xff]   ;;  %v1242_v57 = vld [vmem:[%s1508_s7 + $0x168] ss:$28 sps:$4 sm:$0xff]   ;;  %v1245_v58 = vld [vmem:[%s1508_s7 + $0x19c] ss:$28 sps:$4 sm:$0xff]  }
  0x52   : > { %704 = vmatpush1.bf16.msra.mxu0 %v1194_v21  ;;  %v1243_v59 = vld [vmem:[%s1508_s7 + $0x198] ss:$28 sps:$4 sm:$0xff]   ;;  %v1246_v60 = vld [vmem:[%s1508_s7 + $0x1a0] ss:$28 sps:$4 sm:$0xff]   ;;  %s1578_s11 = scalar_lea.vmem [#allocation3], %s1137_s10  ;;  %s1105_s12 = smul.u32 (%p1352_p5), 56, %s1006_s15 }
  0x53   : > { %747 = vmatpush1.bf16.msra.mxu1 %v1195_v22  ;;  %705 = vmatprep.subr.bf16.mxu0 %v1196_v23 }
  0x54   : > { %748 = vmatprep.subr.bf16.mxu1 %v1198_v24  ;;  %s902_s18 = scalar_lea.vmem (%p1352_p5), %s1628_s3, %s1105_s12 }
  0x56   : > { %706 = vmatpush1.bf16.msra.mxu0 %v1200_v25 }
  0x57   : > { %749 = vmatpush1.bf16.msra.mxu1 %v1201_v26  ;;  %707 = vmatprep.subr.bf16.mxu0 %v1202_v27 }
  0x58   : > { %750 = vmatprep.subr.bf16.mxu1 %v1204_v28 }
  0x5a   : > { %708 = vmatpush1.bf16.msra.mxu0 %v1206_v29 }
  0x5b   : > { %751 = vmatpush1.bf16.msra.mxu1 %v1207_v30  ;;  %709 = vmatprep.subr.bf16.mxu0 %v1208_v31 }
  0x5c   : > { %752 = vmatprep.subr.bf16.mxu1 %v1210_v32 }
  0x5e   : > { %710 = vmatpush1.bf16.msra.mxu0 %v1212_v33 }
  0x5f   : > { %753 = vmatpush1.bf16.msra.mxu1 %v1213_v34  ;;  %781 = vmatprep.subr.bf16.mxu0 %v1217_v35 }
  0x60   : > { %1115 = vmatprep.subr.bf16.mxu1 %v1300_v39 }
  0x61   : > { %728 = vmatmul.mubr.bf16.vlgmr.msra.gmra.mrb[0].mxu0 %v1546_v36 }
  0x62   : > { %771 = vmatmul.mubr.bf16.vlgmr.msra.gmra.mrb[0].mxu1 %v1546_v36  ;;  %782 = vmatpush1.bf16.msra.mxu0 %v1215_v37 }
  0x63   : > { %1116 = vmatpush3.bf16.msra.mxu1 %v1218_v38  ;;  %783 = vmatprep.subr.bf16.mxu0 %v1221_v40 }
  0x64   : > { %1117 = vmatprep.subr.bf16.mxu1 %v1300_v39  ;;  %813 = vmatprep.mubr.bf16.mxu0 %v1299_v0 }
  0x65   : > { %1131 = vmatprep.mubr.msk.bf16.mxu1 %vm1301_vm0, %v1300_v39 }
  0x66   : > { %784 = vmatpush1.bf16.msra.mxu0 %v1219_v41 }
  0x67   : > { %1118 = vmatpush3.bf16.msra.mxu1 %v1222_v42  ;;  %785 = vmatprep.subr.bf16.mxu0 %v1225_v43 }
  0x68   : > { %1119 = vmatprep.subr.bf16.mxu1 %v1300_v39 }
  0x6a   : > { %786 = vmatpush1.bf16.msra.mxu0 %v1223_v44 }
  0x6b   : > { %1120 = vmatpush3.bf16.msra.mxu1 %v1226_v45  ;;  %787 = vmatprep.subr.bf16.mxu0 %v1229_v46 }
  0x6c   : > { %1121 = vmatprep.subr.bf16.mxu1 %v1300_v39 }
  0x6e   : > { %788 = vmatpush1.bf16.msra.mxu0 %v1227_v47 }
  0x6f   : > { %1122 = vmatpush3.bf16.msra.mxu1 %v1230_v48  ;;  %789 = vmatprep.subr.bf16.mxu0 %v1233_v49 }
  0x70   : > { %1123 = vmatprep.subr.bf16.mxu1 %v1300_v39 }
  0x72   : > { %790 = vmatpush1.bf16.msra.mxu0 %v1231_v50 }
  0x73   : > { %1124 = vmatpush3.bf16.msra.mxu1 %v1234_v51  ;;  %791 = vmatprep.subr.bf16.mxu0 %v1237_v52 }
  0x74   : > { %1125 = vmatprep.subr.bf16.mxu1 %v1300_v39 }
  0x76   : > { %792 = vmatpush1.bf16.msra.mxu0 %v1235_v53 }
  0x77   : > { %1126 = vmatpush3.bf16.msra.mxu1 %v1238_v54  ;;  %793 = vmatprep.subr.bf16.mxu0 %v1241_v55 }
  0x78   : > { %1127 = vmatprep.subr.bf16.mxu1 %v1300_v39 }
  0x7a   : > { %794 = vmatpush1.bf16.msra.mxu0 %v1239_v56 }
  0x7b   : > { %1128 = vmatpush3.bf16.msra.mxu1 %v1242_v57  ;;  %795 = vmatprep.subr.bf16.mxu0 %v1245_v58 }
  0x7c   : > { %1129 = vmatprep.subr.bf16.mxu1 %v1300_v39 }
  0x7e   : > { %796 = vmatpush1.bf16.msra.mxu0 %v1243_v59 }
  0x7f   : > { %1130 = vmatpush3.bf16.msra.mxu1 %v1246_v60 }
  0x81   : > { %814 = vmatmul.mubr.bf16.vlgmr.msra.gmra.mrb[4].mxu0 %v1546_v36 }
  0x82   : > { %1132 = vmatmul.mubr.bf16.vlgmr.msra.gmra.mrb[4].mxu1 %v1546_v36 }
  0xbd   : > { %v394_v61 = vpop.permute.xlu0 %393 }
  0xc1   : > { %v399_v62 = vpop.permute.xlu0 %398 }
 0x134   : > { %v729_v63 = vpop.f32.mrb[0].mxu0 }
 0x135   : > { %v772_v0 = vpop.f32.mrb[0].mxu1  ;;  %v730_v1 = vadd.f32 %v729_v63, %v394_v61  ;;  %v731_v3 = vpop.f32.mrb[1].mxu0 }
 0x136   : > { %v773_v2 = vadd.f32 %v772_v0, %v394_v61  ;;  %v774_v4 = vpop.f32.mrb[1].mxu1  ;;  %v732_v5 = vadd.f32 %v731_v3, %v394_v61  ;;  %v733_v7 = vpop.f32.mrb[2].mxu0 }
 0x137   : > { %v775_v6 = vadd.f32 %v774_v4, %v394_v61  ;;  %v776_v8 = vpop.f32.mrb[2].mxu1  ;;  %1247 = vtanh.f32 %v730_v1  ;;  %v734_v9 = vadd.f32 %v733_v7, %v399_v62  ;;  %v735_v10 = vpop.f32.mrb[3].mxu0 }
 0x138   : > { %v778_v11 = vpop.f32.mrb[3].mxu1  ;;  %1249 = vtanh.f32 %v773_v2  ;;  %v777_v12 = vadd.f32 %v776_v8, %v399_v62  ;;  %v736_v13 = vadd.f32 %v735_v10, %v399_v62 }
 0x139   : > { %1251 = vtanh.f32 %v732_v5  ;;  %v779_v14 = vadd.f32 %v778_v11, %v399_v62 }
 0x13a   : > { %1253 = vtanh.f32 %v775_v6 }
 0x13b   : > { %1255 = vtanh.f32 %v734_v9 }
 0x13c   : > { %1257 = vtanh.f32 %v777_v12 }
 0x13d   : > { %1259 = vtanh.f32 %v736_v13 }
 0x13e   : > { %1261 = vtanh.f32 %v779_v14 }
 0x141   : > { %v1248_v15 = vpop.eup %1247 }
 0x142   : > { %v1250_v16 = vpop.eup %1249  ;;  %879 = vst [vmem:[%s1578_s11] sm:$0xff] %v1248_v15 }
 0x143   : > { %v1252_v17 = vpop.eup %1251  ;;  %881 = vst [vmem:[%s1578_s11 + $0x10] sm:$0xff] %v1250_v16 }
 0x144   : > { %v1254_v18 = vpop.eup %1253  ;;  %880 = vst [vmem:[%s1578_s11 + $0x8] sm:$0xff] %v1252_v17 }
 0x145   : > { %v1256_v19 = vpop.eup %1255  ;;  %882 = vst [vmem:[%s1578_s11 + $0x18] sm:$0xff] %v1254_v18 }
 0x146   : > { %v1258_v20 = vpop.eup %1257  ;;  %886 = vst [vmem:[%s1578_s11 + $0x38] sm:$0xff] %v1256_v19 }
 0x147   : > { %v1260_v21 = vpop.eup %1259  ;;  %888 = vst [vmem:[%s1578_s11 + $0x48] sm:$0xff] %v1258_v20 }
 0x148   : > { %v1262_v22 = vpop.eup %1261  ;;  %887 = vst [vmem:[%s1578_s11 + $0x40] sm:$0xff] %v1260_v21 }
 0x149   : > { %889 = vst [vmem:[%s1578_s11 + $0x50] sm:$0xff] %v1262_v22  ;;  %v915_v43 = vld [vmem:[%s1578_s11] sm:$0xff] (%p1352_p5) }
 0x14a   : > { %v919_v45 = vld [vmem:[%s1578_s11 + $0x10] sm:$0xff] (%p1352_p5)  ;;  %916 = vst [vmem:[%s902_s18] sm:$0xff] (%p1352_p5), %v915_v43 }
 0x14b   : > { %v917_v44 = vld [vmem:[%s1578_s11 + $0x8] sm:$0xff] (%p1352_p5)  ;;  %920 = vst [vmem:[%s902_s18 + $0x10] sm:$0xff] (%p1352_p5), %v919_v45 }
 0x14c   : > { %v921_v46 = vld [vmem:[%s1578_s11 + $0x18] sm:$0xff] (%p1352_p5)  ;;  %918 = vst [vmem:[%s902_s18 + $0x8] sm:$0xff] (%p1352_p5), %v917_v44 }
 0x14d   : > { %v929_v50 = vld [vmem:[%s1578_s11 + $0x38] sm:$0xff] (%p1352_p5)  ;;  %922 = vst [vmem:[%s902_s18 + $0x18] sm:$0xff] (%p1352_p5), %v921_v46 }
 0x14e   : > { %930 = vst [vmem:[%s902_s18 + $0x70] sm:$0xff] (%p1352_p5), %v929_v50  ;;  %v933_v52 = vld [vmem:[%s1578_s11 + $0x48] sm:$0xff] (%p1352_p5) }
 0x14f   : > { %v931_v51 = vld [vmem:[%s1578_s11 + $0x40] sm:$0xff] (%p1352_p5)  ;;  %934 = vst [vmem:[%s902_s18 + $0x80] sm:$0xff] (%p1352_p5), %v933_v52 }
 0x150   : > { %932 = vst [vmem:[%s902_s18 + $0x78] sm:$0xff] (%p1352_p5), %v931_v51  ;;  %v935_v53 = vld [vmem:[%s1578_s11 + $0x50] sm:$0xff] (%p1352_p5) }
 0x151   : > { %936 = vst [vmem:[%s902_s18 + $0x88] sm:$0xff] (%p1352_p5), %v935_v53 }
 0x154   : > { %v815_v23 = vpop.f32.mrb[4].mxu0 }
 0x155   : > { %v858_v24 = vpop.f32.mrb[4].mxu1  ;;  %v816_v25 = vadd.f32 %v815_v23, %v394_v61  ;;  %v817_v27 = vpop.f32.mrb[5].mxu0 }
 0x156   : > { %v859_v26 = vadd.f32 %v858_v24, %v394_v61  ;;  %v1133_v28 = vpop.f32.mrb[5].mxu1  ;;  %v818_v29 = vadd.f32 %v817_v27, %v394_v61  ;;  %v819_v30 = vpop.f32.mrb[6].mxu0 }
 0x157   : > { %v861_v31 = vpop.f32.mrb[6].mxu1  ;;  %1263 = vtanh.f32 %v816_v25  ;;  %v820_v32 = vadd.f32 %v819_v30, %v399_v62  ;;  %v821_v34 = vpop.f32.mrb[7].mxu0 }
 0x158   : > { %v862_v33 = vadd.f32 %v861_v31, %v399_v62  ;;  %v1134_v35 = vpop.f32.mrb[7].mxu1  ;;  %1265 = vtanh.f32 %v859_v26  ;;  %v822_v36 = vadd.f32 %v821_v34, %v399_v62 }
 0x159   : > { %1267 = vtanh.f32 %v818_v29 }
 0x15a   : > { %1269 = vtanh.f32 %v820_v32 }
 0x15b   : > { %1271 = vtanh.f32 %v862_v33 }
 0x15c   : > { %1273 = vtanh.f32 %v822_v36 }
 0x161   : > { %v1264_v37 = vpop.eup %1263  ;;  %899 = sbr.rel (!%p1352_p5) target bundleno = 368 (0x170), region = 62 }
 0x162   : > { %v1266_v38 = vpop.eup %1265  ;;  %883 = vst [vmem:[%s1578_s11 + $0x20] sm:$0xff] %v1264_v37 }
 0x163   : > { %v1268_v39 = vpop.eup %1267  ;;  %885 = vst [vmem:[%s1578_s11 + $0x30] sm:$0xff] %v1266_v38 }
 0x164   : > { %v1270_v40 = vpop.eup %1269  ;;  %884 = vst [vmem:[%s1578_s11 + $0x28] sm:$0xff] %v1268_v39 }
 0x165   : > { %v1272_v41 = vpop.eup %1271  ;;  %890 = vst [vmem:[%s1578_s11 + $0x58] sm:$0xff] %v1270_v40 }
 0x166   : > { %v1274_v42 = vpop.eup %1273  ;;  %892 = vst [vmem:[%s1578_s11 + $0x68] sm:$0xff] %v1272_v41 }
 0x167   : > { %891 = vst [vmem:[%s1578_s11 + $0x60] sm:$0xff] %v1274_v42 }
 0x169   : > { %v923_v47 = vld [vmem:[%s1578_s11 + $0x20] sm:$0xff] }
 0x16a   : > { %v927_v49 = vld [vmem:[%s1578_s11 + $0x30] sm:$0xff]  ;;  %924 = vst [vmem:[%s902_s18 + $0x20] sm:$0xff] %v923_v47 }
 0x16b   : > { %v925_v48 = vld [vmem:[%s1578_s11 + $0x28] sm:$0xff]  ;;  %928 = vst [vmem:[%s902_s18 + $0x30] sm:$0xff] %v927_v49 }
 0x16c   : > { %926 = vst [vmem:[%s902_s18 + $0x28] sm:$0xff] %v925_v48  ;;  %v937_v54 = vld [vmem:[%s1578_s11 + $0x58] sm:$0xff] }
 0x16d   : > { %938 = vst [vmem:[%s902_s18 + $0x90] sm:$0xff] %v937_v54  ;;  %v941_v56 = vld [vmem:[%s1578_s11 + $0x68] sm:$0xff] }
 0x16e   : > { %v939_v55 = vld [vmem:[%s1578_s11 + $0x60] sm:$0xff]  ;;  %942 = vst [vmem:[%s902_s18 + $0xa0] sm:$0xff] %v941_v56 }
 0x16f   : > { %940 = vst [vmem:[%s902_s18 + $0x98] sm:$0xff] %v939_v55 }
 0x170 PF: > { %p10_p10 = scmp.ge.s32.totalorder %s1339_s16, 4   ;;  %s1630_s12 = smov %s1293_s13 }
 0x171   : > { %s1631_s13 = smov %s1350_s19  ;;  %s1632_s14 = smov %s1339_s16 }
 0x172   :  { %12 = sbr.rel (!%p10_p10) target bundleno = 2 (0x2), region = 122 }

</bundles_post_ra>
